<compile_context>
chip_gen: v7x
topology: tpu7x:2x2x1
jax: 0.10.0
libtpu: 0.0.40
codegen_flags: <defaults>
</compile_context>

<pallas_src>
import functools

import jax
import jax.numpy as jnp
from jax.experimental import pallas as pl
from jax.experimental.pallas import tpu as pltpu


def _t_mlp_kernel(m_ref, minv_ref, x_ref, *rest, n_layers, apply_relu):
    """Fused tNN MLP on one sample tile.

    rest = (w_hat_0, b_0, w_hat_1, b_1, ..., out_ref)
    x_ref: (d3, fin0, TN) VMEM tile; m_ref/minv_ref: (d3, d3) SMEM.
    """
    o_ref = rest[2 * n_layers]
    d3 = x_ref.shape[0]

    # Current activations, kept per-frontal-face as 2-D (rows, TN) f32 tiles.
    faces = [x_ref[p].astype(jnp.float32) for p in range(d3)]

    for l in range(n_layers):
        w_ref = rest[2 * l]       # (d3, fout, fin)  -- already in the hat domain
        b_ref = rest[2 * l + 1]   # (d3, fout, 1)

        # mode-3 transform  x_hat[q] = sum_p M[q,p] * x[p]   (VPU, unrolled over d3)
        x_hat = []
        for q in range(d3):
            acc = m_ref[q, 0] * faces[0]
            for p in range(1, d3):
                acc = acc + m_ref[q, p] * faces[p]
            x_hat.append(acc)

        # facewise matmul in the hat domain (MXU, f32 accumulation)
        z_hat = [
            jnp.dot(w_ref[q].astype(jnp.float32), x_hat[q],
                    preferred_element_type=jnp.float32)
            for q in range(d3)
        ]

        # inverse mode-3 transform back to the spatial domain + bias + activation
        new_faces = []
        for q in range(d3):
            acc = minv_ref[q, 0] * z_hat[0]
            for p in range(1, d3):
                acc = acc + minv_ref[q, p] * z_hat[p]
            acc = acc + b_ref[q].astype(jnp.float32)   # broadcast over samples
            if apply_relu:
                acc = jnp.maximum(acc, 0.0)
            new_faces.append(acc)
        faces = new_faces

    for q in range(d3):
        o_ref[q] = faces[q].astype(o_ref.dtype)


def _choose_tile(n):
    # lane-dense sample tile; sweep 512-2048 for large workloads
    for tn in (1024, 512, 256, 128):
        if n >= tn:
            return tn
    return 128


def t_fc_forward(x, M, Minv, w_hats, biases, *, activation=None, tile_n=None):
    """Full tFullyConnected forward as a single fused, sample-tiled Pallas kernel."""
    d3, fin0, n = x.shape
    n_layers = len(w_hats)
    fout_last = w_hats[-1].shape[1]
    out_dtype = x.dtype

    tn = tile_n or _choose_tile(n)
    n_pad = pl.cdiv(n, tn) * tn
    if n_pad != n:
        x = jnp.pad(x, ((0, 0), (0, 0), (0, n_pad - n)))

    smem = pl.BlockSpec(memory_space=pltpu.MemorySpace.SMEM)
    in_specs = [
        smem,                                                   # M
        smem,                                                   # Minv
        pl.BlockSpec((d3, fin0, tn), lambda i: (0, 0, i)),      # x tile
    ]
    flat_wb = []
    for w_hat, b in zip(w_hats, biases):
        # constant index_map -> DMA'd once, stays resident across grid steps
        in_specs.append(pl.BlockSpec(w_hat.shape, lambda i: (0, 0, 0)))
        in_specs.append(pl.BlockSpec(b.shape, lambda i: (0, 0, 0)))
        flat_wb += [w_hat, b]

    kern = functools.partial(_t_mlp_kernel, n_layers=n_layers,
                             apply_relu=(activation == "relu"))

    out = pl.pallas_call(
        kern,
        out_shape=jax.ShapeDtypeStruct((d3, fout_last, n_pad), out_dtype),
        grid=(n_pad // tn,),
        in_specs=in_specs,
        out_specs=pl.BlockSpec((d3, fout_last, tn), lambda i: (0, 0, i)),
        compiler_params=pltpu.CompilerParams(
            dimension_semantics=("parallel",),
            vmem_limit_bytes=32 * 1024 * 1024,
        ),
    )(M.astype(jnp.float32), Minv.astype(jnp.float32), x, *flat_wb)

    return out[:, :, :n] if n_pad != n else out


class TFullyConnectedPallas:
    """JAX/Pallas analogue of tnn.networks.t_fully_connected.tFullyConnected."""

    def __init__(self, layer_widths, dim3, M, activation=None, bias=True,
                 key=jax.random.PRNGKey(0)):
        self.M = M.astype(jnp.float32)
        self.Minv = jnp.linalg.inv(self.M)
        self.activation = activation
        self.depth = len(layer_widths)
        self.params = []
        for i in range(self.depth - 1):
            key, kw, kb = jax.random.split(key, 3)
            fin, fout = layer_widths[i], layer_widths[i + 1]
            bound = 1.0 / float(fin) ** 0.5  # kaiming-uniform-ish, deterministic
            w = jax.random.uniform(kw, (dim3, fout, fin), jnp.float32, -bound, bound)
            if bias:
                b = jax.random.uniform(kb, (dim3, fout, 1), jnp.float32, -bound, bound)
            else:
                b = jnp.zeros((dim3, fout, 1), jnp.float32)
            self.params.append((w, b))

        # Hoist the x-independent mode-3 transform of the weights out of the
        # kernel:  W_hat = M x_3 W  (computed once per layer).
        self.w_hats = [
            jnp.einsum('qp,poi->qoi', self.M, w,
                       precision=jax.lax.Precision.HIGHEST).astype(w.dtype)
            for (w, _) in self.params
        ]
        self.biases = [b for (_, b) in self.params]

    def __call__(self, x, tile_n=None):
        return t_fc_forward(x, self.M, self.Minv, self.w_hats, self.biases,
                            activation=self.activation, tile_n=tile_n)

    # pure-JAX reference for verification
    def reference(self, x):
        hp = jax.lax.Precision.HIGHEST

        def mode3(t, mat):
            d3 = t.shape[0]
            return jnp.dot(mat, t.reshape(d3, -1), precision=hp).reshape(t.shape)

        for (w, b) in self.params:
            x_hat = mode3(x, self.M)
            w_hat = mode3(w, self.M)
            z_hat = jnp.einsum('poi,pin->pon', w_hat, x_hat, precision=hp)
            z = mode3(z_hat, self.Minv) + b
            x = jnp.maximum(z, 0.0) if self.activation == "relu" else z
        return x


if __name__ == "__main__":
    key = jax.random.PRNGKey(0)
    k_m, k_x, k_p = jax.random.split(key, 3)

    dim3 = 4
    n_samples = 300           # pads to 512 -> grid of 2 lane-dense (256-wide) tiles
    layer_widths = [16, 32, 8]

    # orthogonal transform matrix M along the tube dimension
    M, _ = jnp.linalg.qr(jax.random.normal(k_m, (dim3, dim3), jnp.float32))
    x = jax.random.normal(k_x, (dim3, layer_widths[0], n_samples), jnp.float32)

    net = TFullyConnectedPallas(layer_widths, dim3, M, activation="relu", key=k_p)

    out = net(x)
    jax.block_until_ready(out)

    assert out.shape == (dim3, layer_widths[-1], n_samples)
    ref = net.reference(x)
    assert jnp.allclose(out, ref, rtol=1e-4, atol=1e-4), "mismatch vs JAX reference"

    print("KERNEL_OK")
</pallas_src>

<mosaic_0001>
module attributes {stable_mosaic.version = 11 : i64} {
  func.func @_t_mlp_kernel(%arg0: i32, %arg1: memref<4x4xf32, #tpu.memory_space<smem>>, %arg2: memref<4x4xf32, #tpu.memory_space<smem>>, %arg3: memref<4x16x256xf32, #tpu.memory_space<vmem>>, %arg4: memref<4x32x16xf32, #tpu.memory_space<vmem>>, %arg5: memref<4x32x1xf32, #tpu.memory_space<vmem>>, %arg6: memref<4x8x32xf32, #tpu.memory_space<vmem>>, %arg7: memref<4x8x1xf32, #tpu.memory_space<vmem>>, %arg8: memref<4x8x256xf32, #tpu.memory_space<vmem>>) attributes {dimension_semantics = [#tpu.dimension_semantics<parallel>], iteration_bounds = array<i64: 2>, scalar_prefetch = 0 : i64, scratch_operands = 0 : i64, tpu.core_type = #tpu.core_type<tc>, window_params = [{transform_indices = @transform_0, window_bounds = array<i64: 4, 4>}, {transform_indices = @transform_1, window_bounds = array<i64: 4, 4>}, {transform_indices = @transform_2, window_bounds = array<i64: 4, 16, 256>}, {pipeline_mode = #tpu.pipeline_mode<synchronous>, transform_indices = @transform_3, window_bounds = array<i64: 4, 32, 16>}, {pipeline_mode = #tpu.pipeline_mode<synchronous>, transform_indices = @transform_4, window_bounds = array<i64: 4, 32, 1>}, {pipeline_mode = #tpu.pipeline_mode<synchronous>, transform_indices = @transform_5, window_bounds = array<i64: 4, 8, 32>}, {pipeline_mode = #tpu.pipeline_mode<synchronous>, transform_indices = @transform_6, window_bounds = array<i64: 4, 8, 1>}, {transform_indices = @transform_7, window_bounds = array<i64: 4, 8, 256>}]} {
    %c0 = arith.constant 0 : index
    %c0_0 = arith.constant 0 : index
    %c0_1 = arith.constant 0 : index
    %0 = vector.load %arg3[%c0, %c0_0, %c0_1] : memref<4x16x256xf32, #tpu.memory_space<vmem>>, vector<1x16x256xf32>
    %1 = vector.shape_cast %0 : vector<1x16x256xf32> to vector<16x256xf32>
    %c1 = arith.constant 1 : index
    %c0_2 = arith.constant 0 : index
    %c0_3 = arith.constant 0 : index
    %2 = vector.load %arg3[%c1, %c0_2, %c0_3] : memref<4x16x256xf32, #tpu.memory_space<vmem>>, vector<1x16x256xf32>
    %3 = vector.shape_cast %2 : vector<1x16x256xf32> to vector<16x256xf32>
    %c2 = arith.constant 2 : index
    %c0_4 = arith.constant 0 : index
    %c0_5 = arith.constant 0 : index
    %4 = vector.load %arg3[%c2, %c0_4, %c0_5] : memref<4x16x256xf32, #tpu.memory_space<vmem>>, vector<1x16x256xf32>
    %5 = vector.shape_cast %4 : vector<1x16x256xf32> to vector<16x256xf32>
    %c3 = arith.constant 3 : index
    %c0_6 = arith.constant 0 : index
    %c0_7 = arith.constant 0 : index
    %6 = vector.load %arg3[%c3, %c0_6, %c0_7] : memref<4x16x256xf32, #tpu.memory_space<vmem>>, vector<1x16x256xf32>
    %7 = vector.shape_cast %6 : vector<1x16x256xf32> to vector<16x256xf32>
    %c0_8 = arith.constant 0 : index
    %c0_9 = arith.constant 0 : index
    %8 = memref.load %arg1[%c0_8, %c0_9] : memref<4x4xf32, #tpu.memory_space<smem>>
    %9 = vector.broadcast %8 : f32 to vector<16x256xf32>
    %10 = arith.mulf %9, %1 : vector<16x256xf32>
    %c0_10 = arith.constant 0 : index
    %c1_11 = arith.constant 1 : index
    %11 = memref.load %arg1[%c0_10, %c1_11] : memref<4x4xf32, #tpu.memory_space<smem>>
    %12 = vector.broadcast %11 : f32 to vector<16x256xf32>
    %13 = arith.mulf %12, %3 : vector<16x256xf32>
    %14 = arith.addf %10, %13 : vector<16x256xf32>
    %c0_12 = arith.constant 0 : index
    %c2_13 = arith.constant 2 : index
    %15 = memref.load %arg1[%c0_12, %c2_13] : memref<4x4xf32, #tpu.memory_space<smem>>
    %16 = vector.broadcast %15 : f32 to vector<16x256xf32>
    %17 = arith.mulf %16, %5 : vector<16x256xf32>
    %18 = arith.addf %14, %17 : vector<16x256xf32>
    %c0_14 = arith.constant 0 : index
    %c3_15 = arith.constant 3 : index
    %19 = memref.load %arg1[%c0_14, %c3_15] : memref<4x4xf32, #tpu.memory_space<smem>>
    %20 = vector.broadcast %19 : f32 to vector<16x256xf32>
    %21 = arith.mulf %20, %7 : vector<16x256xf32>
    %22 = arith.addf %18, %21 : vector<16x256xf32>
    %c1_16 = arith.constant 1 : index
    %c0_17 = arith.constant 0 : index
    %23 = memref.load %arg1[%c1_16, %c0_17] : memref<4x4xf32, #tpu.memory_space<smem>>
    %24 = vector.broadcast %23 : f32 to vector<16x256xf32>
    %25 = arith.mulf %24, %1 : vector<16x256xf32>
    %c1_18 = arith.constant 1 : index
    %c1_19 = arith.constant 1 : index
    %26 = memref.load %arg1[%c1_18, %c1_19] : memref<4x4xf32, #tpu.memory_space<smem>>
    %27 = vector.broadcast %26 : f32 to vector<16x256xf32>
    %28 = arith.mulf %27, %3 : vector<16x256xf32>
    %29 = arith.addf %25, %28 : vector<16x256xf32>
    %c1_20 = arith.constant 1 : index
    %c2_21 = arith.constant 2 : index
    %30 = memref.load %arg1[%c1_20, %c2_21] : memref<4x4xf32, #tpu.memory_space<smem>>
    %31 = vector.broadcast %30 : f32 to vector<16x256xf32>
    %32 = arith.mulf %31, %5 : vector<16x256xf32>
    %33 = arith.addf %29, %32 : vector<16x256xf32>
    %c1_22 = arith.constant 1 : index
    %c3_23 = arith.constant 3 : index
    %34 = memref.load %arg1[%c1_22, %c3_23] : memref<4x4xf32, #tpu.memory_space<smem>>
    %35 = vector.broadcast %34 : f32 to vector<16x256xf32>
    %36 = arith.mulf %35, %7 : vector<16x256xf32>
    %37 = arith.addf %33, %36 : vector<16x256xf32>
    %c2_24 = arith.constant 2 : index
    %c0_25 = arith.constant 0 : index
    %38 = memref.load %arg1[%c2_24, %c0_25] : memref<4x4xf32, #tpu.memory_space<smem>>
    %39 = vector.broadcast %38 : f32 to vector<16x256xf32>
    %40 = arith.mulf %39, %1 : vector<16x256xf32>
    %c2_26 = arith.constant 2 : index
    %c1_27 = arith.constant 1 : index
    %41 = memref.load %arg1[%c2_26, %c1_27] : memref<4x4xf32, #tpu.memory_space<smem>>
    %42 = vector.broadcast %41 : f32 to vector<16x256xf32>
    %43 = arith.mulf %42, %3 : vector<16x256xf32>
    %44 = arith.addf %40, %43 : vector<16x256xf32>
    %c2_28 = arith.constant 2 : index
    %c2_29 = arith.constant 2 : index
    %45 = memref.load %arg1[%c2_28, %c2_29] : memref<4x4xf32, #tpu.memory_space<smem>>
    %46 = vector.broadcast %45 : f32 to vector<16x256xf32>
    %47 = arith.mulf %46, %5 : vector<16x256xf32>
    %48 = arith.addf %44, %47 : vector<16x256xf32>
    %c2_30 = arith.constant 2 : index
    %c3_31 = arith.constant 3 : index
    %49 = memref.load %arg1[%c2_30, %c3_31] : memref<4x4xf32, #tpu.memory_space<smem>>
    %50 = vector.broadcast %49 : f32 to vector<16x256xf32>
    %51 = arith.mulf %50, %7 : vector<16x256xf32>
    %52 = arith.addf %48, %51 : vector<16x256xf32>
    %c3_32 = arith.constant 3 : index
    %c0_33 = arith.constant 0 : index
    %53 = memref.load %arg1[%c3_32, %c0_33] : memref<4x4xf32, #tpu.memory_space<smem>>
    %54 = vector.broadcast %53 : f32 to vector<16x256xf32>
    %55 = arith.mulf %54, %1 : vector<16x256xf32>
    %c3_34 = arith.constant 3 : index
    %c1_35 = arith.constant 1 : index
    %56 = memref.load %arg1[%c3_34, %c1_35] : memref<4x4xf32, #tpu.memory_space<smem>>
    %57 = vector.broadcast %56 : f32 to vector<16x256xf32>
    %58 = arith.mulf %57, %3 : vector<16x256xf32>
    %59 = arith.addf %55, %58 : vector<16x256xf32>
    %c3_36 = arith.constant 3 : index
    %c2_37 = arith.constant 2 : index
    %60 = memref.load %arg1[%c3_36, %c2_37] : memref<4x4xf32, #tpu.memory_space<smem>>
    %61 = vector.broadcast %60 : f32 to vector<16x256xf32>
    %62 = arith.mulf %61, %5 : vector<16x256xf32>
    %63 = arith.addf %59, %62 : vector<16x256xf32>
    %c3_38 = arith.constant 3 : index
    %c3_39 = arith.constant 3 : index
    %64 = memref.load %arg1[%c3_38, %c3_39] : memref<4x4xf32, #tpu.memory_space<smem>>
    %65 = vector.broadcast %64 : f32 to vector<16x256xf32>
    %66 = arith.mulf %65, %7 : vector<16x256xf32>
    %67 = arith.addf %63, %66 : vector<16x256xf32>
    %c0_40 = arith.constant 0 : index
    %c0_41 = arith.constant 0 : index
    %c0_42 = arith.constant 0 : index
    %68 = vector.load %arg4[%c0_40, %c0_41, %c0_42] : memref<4x32x16xf32, #tpu.memory_space<vmem>>, vector<1x32x16xf32>
    %69 = vector.shape_cast %68 : vector<1x32x16xf32> to vector<32x16xf32>
    %cst = arith.constant dense<0.000000e+00> : vector<32x256xf32>
    %70 = tpu.matmul %69, %22, %cst {dimension_numbers = #tpu.dot_dimension_numbers<[1], [0], [0], [1], [0, 0, 1, 1], [], []>} : vector<32x16xf32>, vector<16x256xf32>, vector<32x256xf32> -> vector<32x256xf32>
    %c1_43 = arith.constant 1 : index
    %c0_44 = arith.constant 0 : index
    %c0_45 = arith.constant 0 : index
    %71 = vector.load %arg4[%c1_43, %c0_44, %c0_45] : memref<4x32x16xf32, #tpu.memory_space<vmem>>, vector<1x32x16xf32>
    %72 = vector.shape_cast %71 : vector<1x32x16xf32> to vector<32x16xf32>
    %cst_46 = arith.constant dense<0.000000e+00> : vector<32x256xf32>
    %73 = tpu.matmul %72, %37, %cst_46 {dimension_numbers = #tpu.dot_dimension_numbers<[1], [0], [0], [1], [0, 0, 1, 1], [], []>} : vector<32x16xf32>, vector<16x256xf32>, vector<32x256xf32> -> vector<32x256xf32>
    %c2_47 = arith.constant 2 : index
    %c0_48 = arith.constant 0 : index
    %c0_49 = arith.constant 0 : index
    %74 = vector.load %arg4[%c2_47, %c0_48, %c0_49] : memref<4x32x16xf32, #tpu.memory_space<vmem>>, vector<1x32x16xf32>
    %75 = vector.shape_cast %74 : vector<1x32x16xf32> to vector<32x16xf32>
    %cst_50 = arith.constant dense<0.000000e+00> : vector<32x256xf32>
    %76 = tpu.matmul %75, %52, %cst_50 {dimension_numbers = #tpu.dot_dimension_numbers<[1], [0], [0], [1], [0, 0, 1, 1], [], []>} : vector<32x16xf32>, vector<16x256xf32>, vector<32x256xf32> -> vector<32x256xf32>
    %c3_51 = arith.constant 3 : index
    %c0_52 = arith.constant 0 : index
    %c0_53 = arith.constant 0 : index
    %77 = vector.load %arg4[%c3_51, %c0_52, %c0_53] : memref<4x32x16xf32, #tpu.memory_space<vmem>>, vector<1x32x16xf32>
    %78 = vector.shape_cast %77 : vector<1x32x16xf32> to vector<32x16xf32>
    %cst_54 = arith.constant dense<0.000000e+00> : vector<32x256xf32>
    %79 = tpu.matmul %78, %67, %cst_54 {dimension_numbers = #tpu.dot_dimension_numbers<[1], [0], [0], [1], [0, 0, 1, 1], [], []>} : vector<32x16xf32>, vector<16x256xf32>, vector<32x256xf32> -> vector<32x256xf32>
    %c0_55 = arith.constant 0 : index
    %c0_56 = arith.constant 0 : index
    %80 = memref.load %arg2[%c0_55, %c0_56] : memref<4x4xf32, #tpu.memory_space<smem>>
    %81 = vector.broadcast %80 : f32 to vector<32x256xf32>
    %82 = arith.mulf %81, %70 : vector<32x256xf32>
    %c0_57 = arith.constant 0 : index
    %c1_58 = arith.constant 1 : index
    %83 = memref.load %arg2[%c0_57, %c1_58] : memref<4x4xf32, #tpu.memory_space<smem>>
    %84 = vector.broadcast %83 : f32 to vector<32x256xf32>
    %85 = arith.mulf %84, %73 : vector<32x256xf32>
    %86 = arith.addf %82, %85 : vector<32x256xf32>
    %c0_59 = arith.constant 0 : index
    %c2_60 = arith.constant 2 : index
    %87 = memref.load %arg2[%c0_59, %c2_60] : memref<4x4xf32, #tpu.memory_space<smem>>
    %88 = vector.broadcast %87 : f32 to vector<32x256xf32>
    %89 = arith.mulf %88, %76 : vector<32x256xf32>
    %90 = arith.addf %86, %89 : vector<32x256xf32>
    %c0_61 = arith.constant 0 : index
    %c3_62 = arith.constant 3 : index
    %91 = memref.load %arg2[%c0_61, %c3_62] : memref<4x4xf32, #tpu.memory_space<smem>>
    %92 = vector.broadcast %91 : f32 to vector<32x256xf32>
    %93 = arith.mulf %92, %79 : vector<32x256xf32>
    %94 = arith.addf %90, %93 : vector<32x256xf32>
    %c0_63 = arith.constant 0 : index
    %c0_64 = arith.constant 0 : index
    %c0_65 = arith.constant 0 : index
    %95 = vector.load %arg5[%c0_63, %c0_64, %c0_65] : memref<4x32x1xf32, #tpu.memory_space<vmem>>, vector<1x32x1xf32>
    %96 = vector.shape_cast %95 : vector<1x32x1xf32> to vector<32x1xf32>
    %97 = vector.broadcast %96 : vector<32x1xf32> to vector<32x256xf32>
    %98 = arith.addf %94, %97 : vector<32x256xf32>
    %cst_66 = arith.constant 0.000000e+00 : f32
    %99 = vector.broadcast %cst_66 : f32 to vector<32x256xf32>
    %100 = arith.maximumf %98, %99 : vector<32x256xf32>
    %c1_67 = arith.constant 1 : index
    %c0_68 = arith.constant 0 : index
    %101 = memref.load %arg2[%c1_67, %c0_68] : memref<4x4xf32, #tpu.memory_space<smem>>
    %102 = vector.broadcast %101 : f32 to vector<32x256xf32>
    %103 = arith.mulf %102, %70 : vector<32x256xf32>
    %c1_69 = arith.constant 1 : index
    %c1_70 = arith.constant 1 : index
    %104 = memref.load %arg2[%c1_69, %c1_70] : memref<4x4xf32, #tpu.memory_space<smem>>
    %105 = vector.broadcast %104 : f32 to vector<32x256xf32>
    %106 = arith.mulf %105, %73 : vector<32x256xf32>
    %107 = arith.addf %103, %106 : vector<32x256xf32>
    %c1_71 = arith.constant 1 : index
    %c2_72 = arith.constant 2 : index
    %108 = memref.load %arg2[%c1_71, %c2_72] : memref<4x4xf32, #tpu.memory_space<smem>>
    %109 = vector.broadcast %108 : f32 to vector<32x256xf32>
    %110 = arith.mulf %109, %76 : vector<32x256xf32>
    %111 = arith.addf %107, %110 : vector<32x256xf32>
    %c1_73 = arith.constant 1 : index
    %c3_74 = arith.constant 3 : index
    %112 = memref.load %arg2[%c1_73, %c3_74] : memref<4x4xf32, #tpu.memory_space<smem>>
    %113 = vector.broadcast %112 : f32 to vector<32x256xf32>
    %114 = arith.mulf %113, %79 : vector<32x256xf32>
    %115 = arith.addf %111, %114 : vector<32x256xf32>
    %c1_75 = arith.constant 1 : index
    %c0_76 = arith.constant 0 : index
    %c0_77 = arith.constant 0 : index
    %116 = vector.load %arg5[%c1_75, %c0_76, %c0_77] : memref<4x32x1xf32, #tpu.memory_space<vmem>>, vector<1x32x1xf32>
    %117 = vector.shape_cast %116 : vector<1x32x1xf32> to vector<32x1xf32>
    %118 = vector.broadcast %117 : vector<32x1xf32> to vector<32x256xf32>
    %119 = arith.addf %115, %118 : vector<32x256xf32>
    %cst_78 = arith.constant 0.000000e+00 : f32
    %120 = vector.broadcast %cst_78 : f32 to vector<32x256xf32>
    %121 = arith.maximumf %119, %120 : vector<32x256xf32>
    %c2_79 = arith.constant 2 : index
    %c0_80 = arith.constant 0 : index
    %122 = memref.load %arg2[%c2_79, %c0_80] : memref<4x4xf32, #tpu.memory_space<smem>>
    %123 = vector.broadcast %122 : f32 to vector<32x256xf32>
    %124 = arith.mulf %123, %70 : vector<32x256xf32>
    %c2_81 = arith.constant 2 : index
    %c1_82 = arith.constant 1 : index
    %125 = memref.load %arg2[%c2_81, %c1_82] : memref<4x4xf32, #tpu.memory_space<smem>>
    %126 = vector.broadcast %125 : f32 to vector<32x256xf32>
    %127 = arith.mulf %126, %73 : vector<32x256xf32>
    %128 = arith.addf %124, %127 : vector<32x256xf32>
    %c2_83 = arith.constant 2 : index
    %c2_84 = arith.constant 2 : index
    %129 = memref.load %arg2[%c2_83, %c2_84] : memref<4x4xf32, #tpu.memory_space<smem>>
    %130 = vector.broadcast %129 : f32 to vector<32x256xf32>
    %131 = arith.mulf %130, %76 : vector<32x256xf32>
    %132 = arith.addf %128, %131 : vector<32x256xf32>
    %c2_85 = arith.constant 2 : index
    %c3_86 = arith.constant 3 : index
    %133 = memref.load %arg2[%c2_85, %c3_86] : memref<4x4xf32, #tpu.memory_space<smem>>
    %134 = vector.broadcast %133 : f32 to vector<32x256xf32>
    %135 = arith.mulf %134, %79 : vector<32x256xf32>
    %136 = arith.addf %132, %135 : vector<32x256xf32>
    %c2_87 = arith.constant 2 : index
    %c0_88 = arith.constant 0 : index
    %c0_89 = arith.constant 0 : index
    %137 = vector.load %arg5[%c2_87, %c0_88, %c0_89] : memref<4x32x1xf32, #tpu.memory_space<vmem>>, vector<1x32x1xf32>
    %138 = vector.shape_cast %137 : vector<1x32x1xf32> to vector<32x1xf32>
    %139 = vector.broadcast %138 : vector<32x1xf32> to vector<32x256xf32>
    %140 = arith.addf %136, %139 : vector<32x256xf32>
    %cst_90 = arith.constant 0.000000e+00 : f32
    %141 = vector.broadcast %cst_90 : f32 to vector<32x256xf32>
    %142 = arith.maximumf %140, %141 : vector<32x256xf32>
    %c3_91 = arith.constant 3 : index
    %c0_92 = arith.constant 0 : index
    %143 = memref.load %arg2[%c3_91, %c0_92] : memref<4x4xf32, #tpu.memory_space<smem>>
    %144 = vector.broadcast %143 : f32 to vector<32x256xf32>
    %145 = arith.mulf %144, %70 : vector<32x256xf32>
    %c3_93 = arith.constant 3 : index
    %c1_94 = arith.constant 1 : index
    %146 = memref.load %arg2[%c3_93, %c1_94] : memref<4x4xf32, #tpu.memory_space<smem>>
    %147 = vector.broadcast %146 : f32 to vector<32x256xf32>
    %148 = arith.mulf %147, %73 : vector<32x256xf32>
    %149 = arith.addf %145, %148 : vector<32x256xf32>
    %c3_95 = arith.constant 3 : index
    %c2_96 = arith.constant 2 : index
    %150 = memref.load %arg2[%c3_95, %c2_96] : memref<4x4xf32, #tpu.memory_space<smem>>
    %151 = vector.broadcast %150 : f32 to vector<32x256xf32>
    %152 = arith.mulf %151, %76 : vector<32x256xf32>
    %153 = arith.addf %149, %152 : vector<32x256xf32>
    %c3_97 = arith.constant 3 : index
    %c3_98 = arith.constant 3 : index
    %154 = memref.load %arg2[%c3_97, %c3_98] : memref<4x4xf32, #tpu.memory_space<smem>>
    %155 = vector.broadcast %154 : f32 to vector<32x256xf32>
    %156 = arith.mulf %155, %79 : vector<32x256xf32>
    %157 = arith.addf %153, %156 : vector<32x256xf32>
    %c3_99 = arith.constant 3 : index
    %c0_100 = arith.constant 0 : index
    %c0_101 = arith.constant 0 : index
    %158 = vector.load %arg5[%c3_99, %c0_100, %c0_101] : memref<4x32x1xf32, #tpu.memory_space<vmem>>, vector<1x32x1xf32>
    %159 = vector.shape_cast %158 : vector<1x32x1xf32> to vector<32x1xf32>
    %160 = vector.broadcast %159 : vector<32x1xf32> to vector<32x256xf32>
    %161 = arith.addf %157, %160 : vector<32x256xf32>
    %cst_102 = arith.constant 0.000000e+00 : f32
    %162 = vector.broadcast %cst_102 : f32 to vector<32x256xf32>
    %163 = arith.maximumf %161, %162 : vector<32x256xf32>
    %c0_103 = arith.constant 0 : index
    %c0_104 = arith.constant 0 : index
    %164 = memref.load %arg1[%c0_103, %c0_104] : memref<4x4xf32, #tpu.memory_space<smem>>
    %165 = vector.broadcast %164 : f32 to vector<32x256xf32>
    %166 = arith.mulf %165, %100 : vector<32x256xf32>
    %c0_105 = arith.constant 0 : index
    %c1_106 = arith.constant 1 : index
    %167 = memref.load %arg1[%c0_105, %c1_106] : memref<4x4xf32, #tpu.memory_space<smem>>
    %168 = vector.broadcast %167 : f32 to vector<32x256xf32>
    %169 = arith.mulf %168, %121 : vector<32x256xf32>
    %170 = arith.addf %166, %169 : vector<32x256xf32>
    %c0_107 = arith.constant 0 : index
    %c2_108 = arith.constant 2 : index
    %171 = memref.load %arg1[%c0_107, %c2_108] : memref<4x4xf32, #tpu.memory_space<smem>>
    %172 = vector.broadcast %171 : f32 to vector<32x256xf32>
    %173 = arith.mulf %172, %142 : vector<32x256xf32>
    %174 = arith.addf %170, %173 : vector<32x256xf32>
    %c0_109 = arith.constant 0 : index
    %c3_110 = arith.constant 3 : index
    %175 = memref.load %arg1[%c0_109, %c3_110] : memref<4x4xf32, #tpu.memory_space<smem>>
    %176 = vector.broadcast %175 : f32 to vector<32x256xf32>
    %177 = arith.mulf %176, %163 : vector<32x256xf32>
    %178 = arith.addf %174, %177 : vector<32x256xf32>
    %c1_111 = arith.constant 1 : index
    %c0_112 = arith.constant 0 : index
    %179 = memref.load %arg1[%c1_111, %c0_112] : memref<4x4xf32, #tpu.memory_space<smem>>
    %180 = vector.broadcast %179 : f32 to vector<32x256xf32>
    %181 = arith.mulf %180, %100 : vector<32x256xf32>
    %c1_113 = arith.constant 1 : index
    %c1_114 = arith.constant 1 : index
    %182 = memref.load %arg1[%c1_113, %c1_114] : memref<4x4xf32, #tpu.memory_space<smem>>
    %183 = vector.broadcast %182 : f32 to vector<32x256xf32>
    %184 = arith.mulf %183, %121 : vector<32x256xf32>
    %185 = arith.addf %181, %184 : vector<32x256xf32>
    %c1_115 = arith.constant 1 : index
    %c2_116 = arith.constant 2 : index
    %186 = memref.load %arg1[%c1_115, %c2_116] : memref<4x4xf32, #tpu.memory_space<smem>>
    %187 = vector.broadcast %186 : f32 to vector<32x256xf32>
    %188 = arith.mulf %187, %142 : vector<32x256xf32>
    %189 = arith.addf %185, %188 : vector<32x256xf32>
    %c1_117 = arith.constant 1 : index
    %c3_118 = arith.constant 3 : index
    %190 = memref.load %arg1[%c1_117, %c3_118] : memref<4x4xf32, #tpu.memory_space<smem>>
    %191 = vector.broadcast %190 : f32 to vector<32x256xf32>
    %192 = arith.mulf %191, %163 : vector<32x256xf32>
    %193 = arith.addf %189, %192 : vector<32x256xf32>
    %c2_119 = arith.constant 2 : index
    %c0_120 = arith.constant 0 : index
    %194 = memref.load %arg1[%c2_119, %c0_120] : memref<4x4xf32, #tpu.memory_space<smem>>
    %195 = vector.broadcast %194 : f32 to vector<32x256xf32>
    %196 = arith.mulf %195, %100 : vector<32x256xf32>
    %c2_121 = arith.constant 2 : index
    %c1_122 = arith.constant 1 : index
    %197 = memref.load %arg1[%c2_121, %c1_122] : memref<4x4xf32, #tpu.memory_space<smem>>
    %198 = vector.broadcast %197 : f32 to vector<32x256xf32>
    %199 = arith.mulf %198, %121 : vector<32x256xf32>
    %200 = arith.addf %196, %199 : vector<32x256xf32>
    %c2_123 = arith.constant 2 : index
    %c2_124 = arith.constant 2 : index
    %201 = memref.load %arg1[%c2_123, %c2_124] : memref<4x4xf32, #tpu.memory_space<smem>>
    %202 = vector.broadcast %201 : f32 to vector<32x256xf32>
    %203 = arith.mulf %202, %142 : vector<32x256xf32>
    %204 = arith.addf %200, %203 : vector<32x256xf32>
    %c2_125 = arith.constant 2 : index
    %c3_126 = arith.constant 3 : index
    %205 = memref.load %arg1[%c2_125, %c3_126] : memref<4x4xf32, #tpu.memory_space<smem>>
    %206 = vector.broadcast %205 : f32 to vector<32x256xf32>
    %207 = arith.mulf %206, %163 : vector<32x256xf32>
    %208 = arith.addf %204, %207 : vector<32x256xf32>
    %c3_127 = arith.constant 3 : index
    %c0_128 = arith.constant 0 : index
    %209 = memref.load %arg1[%c3_127, %c0_128] : memref<4x4xf32, #tpu.memory_space<smem>>
    %210 = vector.broadcast %209 : f32 to vector<32x256xf32>
    %211 = arith.mulf %210, %100 : vector<32x256xf32>
    %c3_129 = arith.constant 3 : index
    %c1_130 = arith.constant 1 : index
    %212 = memref.load %arg1[%c3_129, %c1_130] : memref<4x4xf32, #tpu.memory_space<smem>>
    %213 = vector.broadcast %212 : f32 to vector<32x256xf32>
    %214 = arith.mulf %213, %121 : vector<32x256xf32>
    %215 = arith.addf %211, %214 : vector<32x256xf32>
    %c3_131 = arith.constant 3 : index
    %c2_132 = arith.constant 2 : index
    %216 = memref.load %arg1[%c3_131, %c2_132] : memref<4x4xf32, #tpu.memory_space<smem>>
    %217 = vector.broadcast %216 : f32 to vector<32x256xf32>
    %218 = arith.mulf %217, %142 : vector<32x256xf32>
    %219 = arith.addf %215, %218 : vector<32x256xf32>
    %c3_133 = arith.constant 3 : index
    %c3_134 = arith.constant 3 : index
    %220 = memref.load %arg1[%c3_133, %c3_134] : memref<4x4xf32, #tpu.memory_space<smem>>
    %221 = vector.broadcast %220 : f32 to vector<32x256xf32>
    %222 = arith.mulf %221, %163 : vector<32x256xf32>
    %223 = arith.addf %219, %222 : vector<32x256xf32>
    %c0_135 = arith.constant 0 : index
    %c0_136 = arith.constant 0 : index
    %c0_137 = arith.constant 0 : index
    %224 = vector.load %arg6[%c0_135, %c0_136, %c0_137] : memref<4x8x32xf32, #tpu.memory_space<vmem>>, vector<1x8x32xf32>
    %225 = vector.shape_cast %224 : vector<1x8x32xf32> to vector<8x32xf32>
    %cst_138 = arith.constant dense<0.000000e+00> : vector<8x256xf32>
    %226 = tpu.matmul %225, %178, %cst_138 {dimension_numbers = #tpu.dot_dimension_numbers<[1], [0], [0], [1], [0, 0, 1, 1], [], []>} : vector<8x32xf32>, vector<32x256xf32>, vector<8x256xf32> -> vector<8x256xf32>
    %c1_139 = arith.constant 1 : index
    %c0_140 = arith.constant 0 : index
    %c0_141 = arith.constant 0 : index
    %227 = vector.load %arg6[%c1_139, %c0_140, %c0_141] : memref<4x8x32xf32, #tpu.memory_space<vmem>>, vector<1x8x32xf32>
    %228 = vector.shape_cast %227 : vector<1x8x32xf32> to vector<8x32xf32>
    %cst_142 = arith.constant dense<0.000000e+00> : vector<8x256xf32>
    %229 = tpu.matmul %228, %193, %cst_142 {dimension_numbers = #tpu.dot_dimension_numbers<[1], [0], [0], [1], [0, 0, 1, 1], [], []>} : vector<8x32xf32>, vector<32x256xf32>, vector<8x256xf32> -> vector<8x256xf32>
    %c2_143 = arith.constant 2 : index
    %c0_144 = arith.constant 0 : index
    %c0_145 = arith.constant 0 : index
    %230 = vector.load %arg6[%c2_143, %c0_144, %c0_145] : memref<4x8x32xf32, #tpu.memory_space<vmem>>, vector<1x8x32xf32>
    %231 = vector.shape_cast %230 : vector<1x8x32xf32> to vector<8x32xf32>
    %cst_146 = arith.constant dense<0.000000e+00> : vector<8x256xf32>
    %232 = tpu.matmul %231, %208, %cst_146 {dimension_numbers = #tpu.dot_dimension_numbers<[1], [0], [0], [1], [0, 0, 1, 1], [], []>} : vector<8x32xf32>, vector<32x256xf32>, vector<8x256xf32> -> vector<8x256xf32>
    %c3_147 = arith.constant 3 : index
    %c0_148 = arith.constant 0 : index
    %c0_149 = arith.constant 0 : index
    %233 = vector.load %arg6[%c3_147, %c0_148, %c0_149] : memref<4x8x32xf32, #tpu.memory_space<vmem>>, vector<1x8x32xf32>
    %234 = vector.shape_cast %233 : vector<1x8x32xf32> to vector<8x32xf32>
    %cst_150 = arith.constant dense<0.000000e+00> : vector<8x256xf32>
    %235 = tpu.matmul %234, %223, %cst_150 {dimension_numbers = #tpu.dot_dimension_numbers<[1], [0], [0], [1], [0, 0, 1, 1], [], []>} : vector<8x32xf32>, vector<32x256xf32>, vector<8x256xf32> -> vector<8x256xf32>
    %c0_151 = arith.constant 0 : index
    %c0_152 = arith.constant 0 : index
    %236 = memref.load %arg2[%c0_151, %c0_152] : memref<4x4xf32, #tpu.memory_space<smem>>
    %237 = vector.broadcast %236 : f32 to vector<8x256xf32>
    %238 = arith.mulf %237, %226 : vector<8x256xf32>
    %c0_153 = arith.constant 0 : index
    %c1_154 = arith.constant 1 : index
    %239 = memref.load %arg2[%c0_153, %c1_154] : memref<4x4xf32, #tpu.memory_space<smem>>
    %240 = vector.broadcast %239 : f32 to vector<8x256xf32>
    %241 = arith.mulf %240, %229 : vector<8x256xf32>
    %242 = arith.addf %238, %241 : vector<8x256xf32>
    %c0_155 = arith.constant 0 : index
    %c2_156 = arith.constant 2 : index
    %243 = memref.load %arg2[%c0_155, %c2_156] : memref<4x4xf32, #tpu.memory_space<smem>>
    %244 = vector.broadcast %243 : f32 to vector<8x256xf32>
    %245 = arith.mulf %244, %232 : vector<8x256xf32>
    %246 = arith.addf %242, %245 : vector<8x256xf32>
    %c0_157 = arith.constant 0 : index
    %c3_158 = arith.constant 3 : index
    %247 = memref.load %arg2[%c0_157, %c3_158] : memref<4x4xf32, #tpu.memory_space<smem>>
    %248 = vector.broadcast %247 : f32 to vector<8x256xf32>
    %249 = arith.mulf %248, %235 : vector<8x256xf32>
    %250 = arith.addf %246, %249 : vector<8x256xf32>
    %c0_159 = arith.constant 0 : index
    %c0_160 = arith.constant 0 : index
    %c0_161 = arith.constant 0 : index
    %251 = vector.load %arg7[%c0_159, %c0_160, %c0_161] : memref<4x8x1xf32, #tpu.memory_space<vmem>>, vector<1x8x1xf32>
    %252 = vector.shape_cast %251 : vector<1x8x1xf32> to vector<8x1xf32>
    %253 = vector.broadcast %252 : vector<8x1xf32> to vector<8x256xf32>
    %254 = arith.addf %250, %253 : vector<8x256xf32>
    %cst_162 = arith.constant 0.000000e+00 : f32
    %255 = vector.broadcast %cst_162 : f32 to vector<8x256xf32>
    %256 = arith.maximumf %254, %255 : vector<8x256xf32>
    %c1_163 = arith.constant 1 : index
    %c0_164 = arith.constant 0 : index
    %257 = memref.load %arg2[%c1_163, %c0_164] : memref<4x4xf32, #tpu.memory_space<smem>>
    %258 = vector.broadcast %257 : f32 to vector<8x256xf32>
    %259 = arith.mulf %258, %226 : vector<8x256xf32>
    %c1_165 = arith.constant 1 : index
    %c1_166 = arith.constant 1 : index
    %260 = memref.load %arg2[%c1_165, %c1_166] : memref<4x4xf32, #tpu.memory_space<smem>>
    %261 = vector.broadcast %260 : f32 to vector<8x256xf32>
    %262 = arith.mulf %261, %229 : vector<8x256xf32>
    %263 = arith.addf %259, %262 : vector<8x256xf32>
    %c1_167 = arith.constant 1 : index
    %c2_168 = arith.constant 2 : index
    %264 = memref.load %arg2[%c1_167, %c2_168] : memref<4x4xf32, #tpu.memory_space<smem>>
    %265 = vector.broadcast %264 : f32 to vector<8x256xf32>
    %266 = arith.mulf %265, %232 : vector<8x256xf32>
    %267 = arith.addf %263, %266 : vector<8x256xf32>
    %c1_169 = arith.constant 1 : index
    %c3_170 = arith.constant 3 : index
    %268 = memref.load %arg2[%c1_169, %c3_170] : memref<4x4xf32, #tpu.memory_space<smem>>
    %269 = vector.broadcast %268 : f32 to vector<8x256xf32>
    %270 = arith.mulf %269, %235 : vector<8x256xf32>
    %271 = arith.addf %267, %270 : vector<8x256xf32>
    %c1_171 = arith.constant 1 : index
    %c0_172 = arith.constant 0 : index
    %c0_173 = arith.constant 0 : index
    %272 = vector.load %arg7[%c1_171, %c0_172, %c0_173] : memref<4x8x1xf32, #tpu.memory_space<vmem>>, vector<1x8x1xf32>
    %273 = vector.shape_cast %272 : vector<1x8x1xf32> to vector<8x1xf32>
    %274 = vector.broadcast %273 : vector<8x1xf32> to vector<8x256xf32>
    %275 = arith.addf %271, %274 : vector<8x256xf32>
    %cst_174 = arith.constant 0.000000e+00 : f32
    %276 = vector.broadcast %cst_174 : f32 to vector<8x256xf32>
    %277 = arith.maximumf %275, %276 : vector<8x256xf32>
    %c2_175 = arith.constant 2 : index
    %c0_176 = arith.constant 0 : index
    %278 = memref.load %arg2[%c2_175, %c0_176] : memref<4x4xf32, #tpu.memory_space<smem>>
    %279 = vector.broadcast %278 : f32 to vector<8x256xf32>
    %280 = arith.mulf %279, %226 : vector<8x256xf32>
    %c2_177 = arith.constant 2 : index
    %c1_178 = arith.constant 1 : index
    %281 = memref.load %arg2[%c2_177, %c1_178] : memref<4x4xf32, #tpu.memory_space<smem>>
    %282 = vector.broadcast %281 : f32 to vector<8x256xf32>
    %283 = arith.mulf %282, %229 : vector<8x256xf32>
    %284 = arith.addf %280, %283 : vector<8x256xf32>
    %c2_179 = arith.constant 2 : index
    %c2_180 = arith.constant 2 : index
    %285 = memref.load %arg2[%c2_179, %c2_180] : memref<4x4xf32, #tpu.memory_space<smem>>
    %286 = vector.broadcast %285 : f32 to vector<8x256xf32>
    %287 = arith.mulf %286, %232 : vector<8x256xf32>
    %288 = arith.addf %284, %287 : vector<8x256xf32>
    %c2_181 = arith.constant 2 : index
    %c3_182 = arith.constant 3 : index
    %289 = memref.load %arg2[%c2_181, %c3_182] : memref<4x4xf32, #tpu.memory_space<smem>>
    %290 = vector.broadcast %289 : f32 to vector<8x256xf32>
    %291 = arith.mulf %290, %235 : vector<8x256xf32>
    %292 = arith.addf %288, %291 : vector<8x256xf32>
    %c2_183 = arith.constant 2 : index
    %c0_184 = arith.constant 0 : index
    %c0_185 = arith.constant 0 : index
    %293 = vector.load %arg7[%c2_183, %c0_184, %c0_185] : memref<4x8x1xf32, #tpu.memory_space<vmem>>, vector<1x8x1xf32>
    %294 = vector.shape_cast %293 : vector<1x8x1xf32> to vector<8x1xf32>
    %295 = vector.broadcast %294 : vector<8x1xf32> to vector<8x256xf32>
    %296 = arith.addf %292, %295 : vector<8x256xf32>
    %cst_186 = arith.constant 0.000000e+00 : f32
    %297 = vector.broadcast %cst_186 : f32 to vector<8x256xf32>
    %298 = arith.maximumf %296, %297 : vector<8x256xf32>
    %c3_187 = arith.constant 3 : index
    %c0_188 = arith.constant 0 : index
    %299 = memref.load %arg2[%c3_187, %c0_188] : memref<4x4xf32, #tpu.memory_space<smem>>
    %300 = vector.broadcast %299 : f32 to vector<8x256xf32>
    %301 = arith.mulf %300, %226 : vector<8x256xf32>
    %c3_189 = arith.constant 3 : index
    %c1_190 = arith.constant 1 : index
    %302 = memref.load %arg2[%c3_189, %c1_190] : memref<4x4xf32, #tpu.memory_space<smem>>
    %303 = vector.broadcast %302 : f32 to vector<8x256xf32>
    %304 = arith.mulf %303, %229 : vector<8x256xf32>
    %305 = arith.addf %301, %304 : vector<8x256xf32>
    %c3_191 = arith.constant 3 : index
    %c2_192 = arith.constant 2 : index
    %306 = memref.load %arg2[%c3_191, %c2_192] : memref<4x4xf32, #tpu.memory_space<smem>>
    %307 = vector.broadcast %306 : f32 to vector<8x256xf32>
    %308 = arith.mulf %307, %232 : vector<8x256xf32>
    %309 = arith.addf %305, %308 : vector<8x256xf32>
    %c3_193 = arith.constant 3 : index
    %c3_194 = arith.constant 3 : index
    %310 = memref.load %arg2[%c3_193, %c3_194] : memref<4x4xf32, #tpu.memory_space<smem>>
    %311 = vector.broadcast %310 : f32 to vector<8x256xf32>
    %312 = arith.mulf %311, %235 : vector<8x256xf32>
    %313 = arith.addf %309, %312 : vector<8x256xf32>
    %c3_195 = arith.constant 3 : index
    %c0_196 = arith.constant 0 : index
    %c0_197 = arith.constant 0 : index
    %314 = vector.load %arg7[%c3_195, %c0_196, %c0_197] : memref<4x8x1xf32, #tpu.memory_space<vmem>>, vector<1x8x1xf32>
    %315 = vector.shape_cast %314 : vector<1x8x1xf32> to vector<8x1xf32>
    %316 = vector.broadcast %315 : vector<8x1xf32> to vector<8x256xf32>
    %317 = arith.addf %313, %316 : vector<8x256xf32>
    %cst_198 = arith.constant 0.000000e+00 : f32
    %318 = vector.broadcast %cst_198 : f32 to vector<8x256xf32>
    %319 = arith.maximumf %317, %318 : vector<8x256xf32>
    %c0_199 = arith.constant 0 : index
    %c0_200 = arith.constant 0 : index
    %c0_201 = arith.constant 0 : index
    %320 = vector.load %arg8[%c0_199, %c0_200, %c0_201] : memref<4x8x256xf32, #tpu.memory_space<vmem>>, vector<1x8x256xf32>
    %321 = vector.shape_cast %320 : vector<1x8x256xf32> to vector<8x256xf32>
    %322 = vector.shape_cast %256 : vector<8x256xf32> to vector<1x8x256xf32>
    tpu.vector_store %arg8[%c0_199, %c0_200, %c0_201], %322 {strides = array<i32>} : memref<4x8x256xf32, #tpu.memory_space<vmem>>, vector<1x8x256xf32>,
    %c1_202 = arith.constant 1 : index
    %c0_203 = arith.constant 0 : index
    %c0_204 = arith.constant 0 : index
    %323 = vector.load %arg8[%c1_202, %c0_203, %c0_204] : memref<4x8x256xf32, #tpu.memory_space<vmem>>, vector<1x8x256xf32>
    %324 = vector.shape_cast %323 : vector<1x8x256xf32> to vector<8x256xf32>
    %325 = vector.shape_cast %277 : vector<8x256xf32> to vector<1x8x256xf32>
    tpu.vector_store %arg8[%c1_202, %c0_203, %c0_204], %325 {strides = array<i32>} : memref<4x8x256xf32, #tpu.memory_space<vmem>>, vector<1x8x256xf32>,
    %c2_205 = arith.constant 2 : index
    %c0_206 = arith.constant 0 : index
    %c0_207 = arith.constant 0 : index
    %326 = vector.load %arg8[%c2_205, %c0_206, %c0_207] : memref<4x8x256xf32, #tpu.memory_space<vmem>>, vector<1x8x256xf32>
    %327 = vector.shape_cast %326 : vector<1x8x256xf32> to vector<8x256xf32>
    %328 = vector.shape_cast %298 : vector<8x256xf32> to vector<1x8x256xf32>
    tpu.vector_store %arg8[%c2_205, %c0_206, %c0_207], %328 {strides = array<i32>} : memref<4x8x256xf32, #tpu.memory_space<vmem>>, vector<1x8x256xf32>,
    %c3_208 = arith.constant 3 : index
    %c0_209 = arith.constant 0 : index
    %c0_210 = arith.constant 0 : index
    %329 = vector.load %arg8[%c3_208, %c0_209, %c0_210] : memref<4x8x256xf32, #tpu.memory_space<vmem>>, vector<1x8x256xf32>
    %330 = vector.shape_cast %329 : vector<1x8x256xf32> to vector<8x256xf32>
    %331 = vector.shape_cast %319 : vector<8x256xf32> to vector<1x8x256xf32>
    tpu.vector_store %arg8[%c3_208, %c0_209, %c0_210], %331 {strides = array<i32>} : memref<4x8x256xf32, #tpu.memory_space<vmem>>, vector<1x8x256xf32>,
    return
  }
  func.func @transform_0(%arg0: i32) -> (i32, i32) {
    %c0_i32 = arith.constant 0 : i32
    %c0_i32_0 = arith.constant 0 : i32
    %c0_i32_1 = arith.constant 0 : i32
    return %c0_i32, %c0_i32_0 : i32, i32
  }
  func.func @transform_1(%arg0: i32) -> (i32, i32) {
    %c0_i32 = arith.constant 0 : i32
    %c0_i32_0 = arith.constant 0 : i32
    %c0_i32_1 = arith.constant 0 : i32
    return %c0_i32, %c0_i32_0 : i32, i32
  }
  func.func @transform_2(%arg0: i32) -> (i32, i32, i32) {
    %c0_i32 = arith.constant 0 : i32
    %c0_i32_0 = arith.constant 0 : i32
    %c0_i32_1 = arith.constant 0 : i32
    return %c0_i32, %c0_i32_0, %arg0 : i32, i32, i32
  }
  func.func @transform_3(%arg0: i32) -> (i32, i32, i32) {
    %c0_i32 = arith.constant 0 : i32
    %c0_i32_0 = arith.constant 0 : i32
    %c0_i32_1 = arith.constant 0 : i32
    %c0_i32_2 = arith.constant 0 : i32
    return %c0_i32, %c0_i32_0, %c0_i32_1 : i32, i32, i32
  }
  func.func @transform_4(%arg0: i32) -> (i32, i32, i32) {
    %c0_i32 = arith.constant 0 : i32
    %c0_i32_0 = arith.constant 0 : i32
    %c0_i32_1 = arith.constant 0 : i32
    %c0_i32_2 = arith.constant 0 : i32
    return %c0_i32, %c0_i32_0, %c0_i32_1 : i32, i32, i32
  }
  func.func @transform_5(%arg0: i32) -> (i32, i32, i32) {
    %c0_i32 = arith.constant 0 : i32
    %c0_i32_0 = arith.constant 0 : i32
    %c0_i32_1 = arith.constant 0 : i32
    %c0_i32_2 = arith.constant 0 : i32
    return %c0_i32, %c0_i32_0, %c0_i32_1 : i32, i32, i32
  }
  func.func @transform_6(%arg0: i32) -> (i32, i32, i32) {
    %c0_i32 = arith.constant 0 : i32
    %c0_i32_0 = arith.constant 0 : i32
    %c0_i32_1 = arith.constant 0 : i32
    %c0_i32_2 = arith.constant 0 : i32
    return %c0_i32, %c0_i32_0, %c0_i32_1 : i32, i32, i32
  }
  func.func @transform_7(%arg0: i32) -> (i32, i32, i32) {
    %c0_i32 = arith.constant 0 : i32
    %c0_i32_0 = arith.constant 0 : i32
    %c0_i32_1 = arith.constant 0 : i32
    return %c0_i32, %c0_i32_0, %arg0 : i32, i32, i32
  }
}

</mosaic_0001>

<bundles_post_ra>
// kernel: tpu_custom_call.1
= control target key start
LH: loop header
LB: loop body
LE: loop exit
PB: predicated region body
PF: predicated region fallthrough
CT: control target
= control target key end

     0   :  { %s3778_s0 = inlined_call_operand.vmem [shape: f32[4,4], index: 0, kind: input, shape index: {}]   ;;  %s3779_s1 = inlined_call_operand.vmem [shape: f32[4,4], index: 1, kind: input, shape index: {}]   ;;  %s3780_s2 = inlined_call_operand.vmem [shape: f32[4,16,512], index: 2, kind: input, shape index: {}]   ;;  %s3781_s3 = inlined_call_operand.vmem [shape: f32[4,32,16], index: 3, kind: input, shape index: {}]   ;;  %s3782_s4 = inlined_call_operand.vmem [shape: f32[4,32,1], index: 4, kind: input, shape index: {}]   ;;  %s3783_s5 = inlined_call_operand.vmem [shape: f32[4,8,32], index: 5, kind: input, shape index: {}]   ;;  %s3784_s6 = inlined_call_operand.vmem [shape: f32[4,8,1], index: 6, kind: input, shape index: {}]   ;;  %s3785_s7 = inlined_call_operand.hbm [shape: f32[4,8,512], index: 7, kind: output, shape index: {}]  }
   0x1   :  { %3855 = sst [smem:[#allocation57_spill]] %s3778_s0 }
   0x2   :  { %3856 = sst [smem:[#allocation58_spill]] %s3779_s1 }
   0x3   :  { %3857 = sst [smem:[#allocation59_spill]] %s3780_s2 }
   0x4   :  { %12 = vsyncpa [#allocation4], 0 }
   0x5   :  { %13 = vsyncpa [#allocation6], 0 }
   0x6   :  { %14 = vsyncpa [#allocation3], 0 }
   0x7   :  { %16 = vsyncpa [#allocation3 + $0x1], 0  ;;  %s2487_s24 = smov 0   ;;  %s2489_s25 = smov 0  }
   0x8   :  { %s2491_s26 = smov 0   ;;  %s2493_s27 = smov 0  }
   0x9 LB: > { %s2508_s28 = sadd.s32 4294967295, %s2437_s27   ;;  %s2104_s29 = sadd.s32 4294967294, %s2437_s27   ;;  %s2437_s27 = sphi %s2493_s27, %s3968_s27   ;;  %s2433_s26 = sphi %s2491_s26, %s3967_s26   ;;  %s2429_s25 = sphi %s2489_s25, %s3966_s25   ;;  %s2425_s24 = sphi %s2487_s24, %s3965_s24  }
   0xa   : > { %s2512_s30 = sadd.s32 1, %s2437_s27   ;;  %s71_s8 = sadd.s32 1, %s2433_s26 }
   0xb   : > { %s68_s9 = ssub.s32 %s2437_s27, %s2512_s30  ;;  %p78_p0 = scmp.ne.s32.totalorder %s2433_s26, %s2429_s25 }
   0xc   : > { %p69_p1 = scmp.eq.s32.totalorder %s68_s9, 0  ;;  %p79_p2 = scmp.eq.s32.totalorder %s2437_s27, 0 }
   0xd   : > { %p192_p3 = scmp.eq.s32.totalorder %s2508_s28, 1  ;;  %p197_p4 = scmp.ne.s32.totalorder %s2429_s25, %s2425_s24 }
   0xe   : > { %s2524_s10 = scalar_select %p69_p1, %s2433_s26, %s71_s8  }
   0xf   : > { %p2526_p5 = por %p79_p2, %p78_p0  ;;  %p2530_p6 = por %p192_p3, %p78_p0 }
  0x10   : > { %p198_p7 = scmp.eq.s32.totalorder %s2104_s29, 1  ;;  %p2105_p8 = scmp.ge.s32.totalorder %s2437_s27, 1 }
  0x11   : > { %s3858_s11 = scalar_select %p2526_p5, 1, 0 }
  0x12   : > { %s3859_s12 = scalar_select %p2530_p6, 1, 0 }
  0x13   : > { %p205_p9 = scmp.lt.s32.totalorder %s2437_s27, 3  ;;  %p2536_p10 = por %p198_p7, %p197_p4 }
  0x14   : > { %p3786_p11 = scmp.eq.s32.totalorder %s2508_s28, 0  ;;  %s3862_s0 = sld [smem:[#allocation57_spill]] }
  0x15   : > { %s3860_s13 = scalar_select %p2536_p10, 1, 0 }
  0x16   : > { %p2541_p12 = pnand %p2105_p8, %p205_p9  ;;  %s3863_s1 = sld [smem:[#allocation58_spill]] }
  0x18   : > { %s3861_s14 = scalar_select %p2541_p12, 1, 0 }
  0x19   : > { %p2280_p13 = pneg %p2541_p12 }
  0x1a   : > { %s218_s17 = sshll.u32 %s3862_s0, 4  ;;  %s219_s17 = int_to_ptr.vmem [resolvable:$true] %s218_s17 }
  0x1b   : > { %p2555_p0 = pnand %p3786_p11, %p2280_p13  ;;  %s2337_s22 = scalar_lea.vmem %s219_s17, 64 }
  0x1c   : > { %s229_s20 = sshll.u32 %s3863_s1, 4  ;;  %p2338_p1 = scmp.ne.s32.totalorder %s219_s17, %s2337_s22  ;;  %s230_s20 = int_to_ptr.vmem [resolvable:$true] %s229_s20 }
  0x1d   : > { %p2339_p2 = pneg %p2555_p0  ;;  %p2345_p7 = scmp.lt.s32.totalorder %s219_s17, %s219_s17 }
  0x1e   : > { %p2346_p8 = scmp.lt.s32.totalorder %s2337_s22, %s2337_s22 }
  0x1f   : > { %p2340_p3 = pnand %p2339_p2, %p2338_p1 }
  0x20   : > { %p2347_p9 = por %p2346_p8, %p2345_p7 }
  0x21   : > { %p2341_p4 = pneg %p2340_p3 }
  0x23   : > { %p2348_p10 = pnand %p2347_p9, %p2341_p4 }
  0x25   : > { %2351 = shalt.err (!%p2348_p10)
}
  0x26   : > { %s2439_s23 = smov [#allocation2]   ;;  %s2352_s29 = scalar_lea.vmem %s230_s20, 64 }
  0x27   : > { %2283 = dma.vmem_to_smem (!%p2555_p0), %s219_s17, 64, %s2439_s23, [#allocation4]  }
  0x28   : > { %p2353_p13 = scmp.ne.s32.totalorder %s230_s20, %s2352_s29  ;;  %p2360_p12 = scmp.lt.s32.totalorder %s230_s20, %s230_s20 }
  0x29   : > { %p2361_p5 = scmp.lt.s32.totalorder %s2352_s29, %s2352_s29 }
  0x2a   : > { %p2355_p11 = pnand %p2353_p13, %p2339_p2 }
  0x2b   : > { %p2362_p1 = por %p2361_p5, %p2360_p12 }
  0x2c   : > { %p2356_p6 = pneg %p2355_p11 }
  0x2e   : > { %p2363_p3 = pnand %p2362_p1, %p2356_p6 }
  0x30   : > { %2366 = shalt.err (!%p2363_p3)
}
  0x31   : > { %s2440_s8 = smov [#allocation5]   ;;  %p2108_p10 = scmp.ge.s32.totalorder %s2437_s27, 2 }
  0x32   : > { %2286 = dma.vmem_to_smem (!%p2555_p0), %s230_s20, 64, %s2440_s8, [#allocation6]  }
  0x33   : > { %248 = sbr.rel (%p2108_p10) target bundleno = 76 (0x4c), region = 40  ;;  %p3865_p4 = scmp.ne.s32.totalorder (!%p2108_p10), %s3858_s11, 0 }
  0x3a   : > { %251 = sbr.rel (!%p3865_p4) target bundleno = 76 (0x4c), region = 44  ;;  %s253_s9 = sand.u32 (%p3865_p4), 1, %s2433_s26  }
  0x3b   : > { %s2220_s15 = sshll.u32 (%p3865_p4), %s2437_s27, 4  ;;  %s2109_s16 = sshll.u32 (%p3865_p4), %s253_s9, 7 }
  0x3c   : > { %s3866_s2 = sld [smem:[#allocation59_spill]] (%p3865_p4)  ;;  %s255_s11 = scalar_lea.vmem (%p3865_p4), [#allocation7], %s2109_s16 }
  0x42   : > { %s2575_s19 = scalar_lea.vmem %s3866_s2, %s2220_s15 }
  0x43   : > { %v271_v0 = vld [vmem:[%s2575_s19] sm:$0xff]  ;;  %v273_v1 = vld [vmem:[%s2575_s19 + $0x8] sm:$0xff] }
  0x44   : > { %v275_v2 = vld [vmem:[%s2575_s19 + $0x20] sm:$0xff]  ;;  %272 = vst [vmem:[%s255_s11] sm:$0xff] %v271_v0  ;;  %274 = vst [vmem:[%s255_s11 + $0x8] sm:$0xff] %v273_v1  ;;  %v277_v3 = vld [vmem:[%s2575_s19 + $0x28] sm:$0xff] }
  0x45   : > { %276 = vst [vmem:[%s255_s11 + $0x10] sm:$0xff] %v275_v2  ;;  %v279_v4 = vld [vmem:[%s2575_s19 + $0x40] sm:$0xff]  ;;  %v281_v5 = vld [vmem:[%s2575_s19 + $0x48] sm:$0xff]  ;;  %278 = vst [vmem:[%s255_s11 + $0x18] sm:$0xff] %v277_v3 }
  0x46   : > { %280 = vst [vmem:[%s255_s11 + $0x20] sm:$0xff] %v279_v4  ;;  %282 = vst [vmem:[%s255_s11 + $0x28] sm:$0xff] %v281_v5  ;;  %v283_v6 = vld [vmem:[%s2575_s19 + $0x60] sm:$0xff]  ;;  %v285_v7 = vld [vmem:[%s2575_s19 + $0x68] sm:$0xff] }
  0x47   : > { %v287_v8 = vld [vmem:[%s2575_s19 + $0x80] sm:$0xff]  ;;  %284 = vst [vmem:[%s255_s11 + $0x30] sm:$0xff] %v283_v6  ;;  %286 = vst [vmem:[%s255_s11 + $0x38] sm:$0xff] %v285_v7  ;;  %v289_v9 = vld [vmem:[%s2575_s19 + $0x88] sm:$0xff] }
  0x48   : > { %288 = vst [vmem:[%s255_s11 + $0x40] sm:$0xff] %v287_v8  ;;  %v291_v10 = vld [vmem:[%s2575_s19 + $0xa0] sm:$0xff]  ;;  %v293_v11 = vld [vmem:[%s2575_s19 + $0xa8] sm:$0xff]  ;;  %290 = vst [vmem:[%s255_s11 + $0x48] sm:$0xff] %v289_v9 }
  0x49   : > { %292 = vst [vmem:[%s255_s11 + $0x50] sm:$0xff] %v291_v10  ;;  %294 = vst [vmem:[%s255_s11 + $0x58] sm:$0xff] %v293_v11  ;;  %v295_v12 = vld [vmem:[%s2575_s19 + $0xc0] sm:$0xff]  ;;  %v297_v13 = vld [vmem:[%s2575_s19 + $0xc8] sm:$0xff] }
  0x4a   : > { %v299_v14 = vld [vmem:[%s2575_s19 + $0xe0] sm:$0xff]  ;;  %296 = vst [vmem:[%s255_s11 + $0x60] sm:$0xff] %v295_v12  ;;  %298 = vst [vmem:[%s255_s11 + $0x68] sm:$0xff] %v297_v13  ;;  %v301_v15 = vld [vmem:[%s2575_s19 + $0xe8] sm:$0xff] }
  0x4b   : > { %300 = vst [vmem:[%s255_s11 + $0x70] sm:$0xff] %v299_v14  ;;  %302 = vst [vmem:[%s255_s11 + $0x78] sm:$0xff] %v301_v15 }
  0x4c PF: > { %p3867_p5 = scmp.ne.s32.totalorder %s3861_s14, 0 }
  0x4e   : > { %311 = sbr.rel (%p3867_p5) target bundleno = 719 (0x2cf), region = 67 }
  0x55   : > { %p3868_p6 = scmp.eq.s32.totalorder %s2508_s28, 0 }
  0x57   : > { %2412 = dma.done.wait (%p3868_p6), [#allocation4], 64   ;;  %p3869_p11 = pmov %p3868_p6 }
  0x58   : > { %p3870_p12 = pmov %p3868_p6 }
  0x59   : > { %2414 = vsyncadd (%p3869_p11), [#allocation4], 4294967232 }
  0x5a   : > { %2416 = dma.done.wait (%p3870_p12), [#allocation6], 64   ;;  %p3871_p0 = pmov %p3868_p6 }
  0x5b   : > { %s2604_s20 = sand.u32 1, %s2429_s25  }
  0x5c   : > { %2418 = vsyncadd (%p3871_p0), [#allocation6], 4294967232  ;;  %s2115_s21 = sshll.u32 %s2604_s20, 7 }
  0x5d   : > { %s2607_s22 = scalar_lea.vmem [#allocation7], %s2115_s21 }
  0x5e   : > { %328 = sfence }
  0x5f   : > { %s375_s14 = sld [smem:[#allocation2]]  ;;  %s2129_s23 = sld [smem:[#allocation2 + $0x1]]  ;;  %v3789_v16 = vmov 0.0   ;;  %v2612_v17 = vld [vmem:[%s2607_s22 + $0x8] sm:$0xff]  ;;  %v2615_v18 = vld [vmem:[%s2607_s22 + $0x18] sm:$0xff]  ;;  %v2622_v19 = vld [vmem:[%s2607_s22] sm:$0xff] }
  0x60   : > { %600 = vmatprep.mubr.f32.mxu0 %v3789_v16  ;;  %706 = vmatprep.mubr.f32.mxu1 %v3789_v16  ;;  %s2130_s29 = sld [smem:[#allocation2 + $0x2]]  ;;  %s2131_s8 = sld [smem:[#allocation2 + $0x3]]  ;;  %v2625_v20 = vld [vmem:[%s2607_s22 + $0x28] sm:$0xff]  ;;  %v2628_v21 = vld [vmem:[%s2607_s22 + $0x38] sm:$0xff]  ;;  %v2442_v27 = vmov 0   ;;  %v2681_v48 = vld [vmem:[%s2607_s22 + $0x10] sm:$0xff] }
  0x61   : > { %s2132_s9 = sld [smem:[#allocation2 + $0x80]]  ;;  %s2133_s15 = sld [smem:[#allocation2 + $0x81]]  ;;  %v2631_v22 = vld [vmem:[%s2607_s22 + $0x48] sm:$0xff]  ;;  %v2634_v23 = vld [vmem:[%s2607_s22 + $0x58] sm:$0xff]  ;;  %2336 = vset.pattern.permute.xlu1 %v2442_v27  ;;  %2335 = vset.pattern.permute.xlu0 %v2442_v27  ;;  %v2684_v49 = vld [vmem:[%s2607_s22 + $0x20] sm:$0xff]  ;;  %vm523_vm0 = vcmask 130048  }
  0x62   : > { %s2617_s16 = sld [smem:[#allocation2 + $0x82]]  ;;  %s2619_s17 = sld [smem:[#allocation2 + $0x83]]  ;;  %v2637_v24 = vld [vmem:[%s2607_s22 + $0x68] sm:$0xff]  ;;  %v2640_v25 = vld [vmem:[%s2607_s22 + $0x78] sm:$0xff]  ;;  %v2693_v54 = vld [vmem:[%s2607_s22 + $0x30] sm:$0xff]  ;;  %vm1587_vm1 = vcmask 261120  }
  0x63   : > { %v2696_v55 = vld [vmem:[%s2607_s22 + $0x40] sm:$0xff]  ;;  %v2703_v60 = vld [vmem:[%s2607_s22 + $0x50] sm:$0xff]  ;;  %s2705_s18 = sld [smem:[#allocation2 + $0x100]]  ;;  %v2180_v13 = vld [vmem:[%s3782_s4 + $0x28] sm:$0xff]  ;;  %s2185_s19 = sld [smem:[#allocation5 + $0x102]] }
  0x64   : > { %v2179_v61 = vld [vmem:[%s3782_s4 + $0x20] sm:$0xff]  ;;  %v2725_v6 = vld [vmem:[%s2607_s22 + $0x70] sm:$0xff]  ;;  %s2768_s11 = sld [smem:[#allocation2 + $0x180]]  ;;  %s2174_s21 = sld [smem:[#allocation5 + $0x3]] }
  0x65   : > { %v2642_v26 = vstv %s375_s14  ;;  %v2648_v30 = vstv %s2129_s23  ;;  %v1007_v62 = vld [vmem:[%s3782_s4] sm:$0xff]  ;;  %s2720_s23 = sld [smem:[#allocation2 + $0x101]]  ;;  %1118 = vperm.xlu1 %2336, %v2179_v61   ;;  %s943_s14 = sld [smem:[#allocation5]] }
  0x66   : > { %3872 = vst [vmem:[#allocation12_spill] sm:$0xff] %v2642_v26  ;;  %v378_v28 = vmul.f32 %v2642_v26, %v2612_v17  ;;  %v380_v29 = vmul.f32 %v2642_v26, %v2615_v18  ;;  %3873 = vst [vmem:[#allocation13_spill] sm:$0xff] %v2648_v30  ;;  %v377_v31 = vmul.f32 %v2642_v26, %v2622_v19  ;;  %v2656_v34 = vstv %s2130_s29  ;;  %v2718_v3 = vld [vmem:[%s2607_s22 + $0x60] sm:$0xff]  ;;  %s2722_s29 = sld [smem:[#allocation2 + $0x102]]  ;;  %s2804_s22 = sld [smem:[#allocation2 + $0x183]] }
  0x67   : > { %v384_v32 = vmul.f32 %v2625_v20, %v2648_v30  ;;  %v386_v33 = vmul.f32 %v2628_v21, %v2648_v30  ;;  %3874 = vst [vmem:[#allocation14_spill] sm:$0xff] %v2656_v34  ;;  %v2658_v35 = vstv %s2131_s8  ;;  %v394_v36 = vmul.f32 %v2631_v22, %v2656_v34  ;;  %1013 = vperm.xlu0 %2335, %v1007_v62   ;;  %s2786_s8 = sld [smem:[#allocation2 + $0x181]]  ;;  %s2178_s0 = sld [smem:[#allocation5 + $0x83]] }
  0x68   : > { %3875 = vst [vmem:[#allocation15_spill] sm:$0xff] %v2658_v35  ;;  %v396_v37 = vmul.f32 %v2634_v23, %v2656_v34  ;;  %v404_v38 = vmul.f32 %v2637_v24, %v2658_v35  ;;  %v406_v39 = vmul.f32 %v2640_v25, %v2658_v35  ;;  %v2668_v42 = vstv %s2132_s9  ;;  %s2742_s9 = sld [smem:[#allocation2 + $0x103]]  ;;  %p3963_p7 = scmp.ne.s32.totalorder %s3859_s12, 0 }
  0x69   : > { %v388_v40 = vadd.f32 %v384_v32, %v378_v28  ;;  %v390_v41 = vadd.f32 %v386_v33, %v380_v29  ;;  %3876 = vst [vmem:[#allocation16_spill] sm:$0xff] %v2668_v42  ;;  %v2670_v43 = vstv %s2133_s15  ;;  %v414_v44 = vmul.f32 %v2668_v42, %v2612_v17  ;;  %v1008_v29 = vld [vmem:[%s3782_s4 + $0x8] sm:$0xff]  ;;  %1123 = vperm.xlu1 %2336, %v2180_v13   ;;  %s2191_s15 = sld [smem:[#allocation5 + $0x180]]  ;;  %s2186_s1 = sld [smem:[#allocation5 + $0x103]] }
  0x6a   : > { %3877 = vst [vmem:[#allocation17_spill] sm:$0xff] %v2670_v43  ;;  %v416_v45 = vmul.f32 %v2668_v42, %v2615_v18  ;;  %v420_v46 = vmul.f32 %v2625_v20, %v2670_v43  ;;  %v422_v47 = vmul.f32 %v2628_v21, %v2670_v43  ;;  %v2687_v52 = vstv %s2617_s16  ;;  %s2176_s16 = sld [smem:[#allocation5 + $0x81]]  ;;  %s2194_s2 = sld [smem:[#allocation5 + $0x183]] }
  0x6b   : > { %v398_v50 = vadd.f32 %v394_v36, %v388_v40  ;;  %v400_v51 = vadd.f32 %v396_v37, %v390_v41  ;;  %3878 = vst [vmem:[#allocation18_spill] sm:$0xff] %v2687_v52  ;;  %v2690_v53 = vstv %s2619_s17  ;;  %v430_v58 = vmul.f32 %v2631_v22, %v2687_v52  ;;  %1018 = vperm.xlu0 %2335, %v1008_v29   ;;  %s2177_s17 = sld [smem:[#allocation5 + $0x82]] }
  0x6c   : > { %3879 = vst [vmem:[#allocation19_spill] sm:$0xff] %v2690_v53  ;;  %v424_v56 = vadd.f32 %v420_v46, %v414_v44  ;;  %v426_v57 = vadd.f32 %v422_v47, %v416_v45  ;;  %v432_v59 = vmul.f32 %v2634_v23, %v2687_v52  ;;  %v440_v1 = vmul.f32 %v2637_v24, %v2690_v53  ;;  %v2188_v47 = vld [vmem:[%s3782_s4 + $0x48] sm:$0xff] }
  0x6d   : > { %v408_v63 = vadd.f32 %v404_v38, %v398_v50  ;;  %v410_v0 = vadd.f32 %v406_v39, %v400_v51  ;;  %v442_v2 = vmul.f32 %v2640_v25, %v2690_v53  ;;  %v379_v7 = vmul.f32 %v2642_v26, %v2681_v48  ;;  %1228 = vperm.xlu1 %2336, %v2188_v47  }
  0x6e   : > { %v434_v4 = vadd.f32 %v430_v58, %v424_v56  ;;  %v436_v5 = vadd.f32 %v432_v59, %v426_v57  ;;  %v383_v8 = vmul.f32 %v2684_v49, %v2648_v30  ;;  %v385_v10 = vmul.f32 %v2693_v54, %v2648_v30  ;;  %v2187_v58 = vld [vmem:[%s3782_s4 + $0x40] sm:$0xff] }
  0x6f   : > { %v2222_v9 = vpack.c.bf16 %v410_v0, %v408_v63  ;;  %v393_v11 = vmul.f32 %v2696_v55, %v2656_v34  ;;  %v395_v12 = vmul.f32 %v2703_v60, %v2656_v34  ;;  %v403_v28 = vmul.f32 %v2718_v3, %v2658_v35  ;;  %1223 = vperm.xlu0 %2335, %v2187_v58  }
  0x70   : > { %v444_v14 = vadd.f32 %v440_v1, %v434_v4  ;;  %v446_v15 = vadd.f32 %v442_v2, %v436_v5  ;;  %v387_v27 = vadd.f32 %v383_v8, %v377_v31  ;;  %v389_v32 = vadd.f32 %v385_v10, %v379_v7  ;;  %v1010_v10 = vld [vmem:[%s3782_s4 + $0x18] sm:$0xff] }
  0x71   : > { %2223 = vmatprep.subr.bf16.mxu0 %v2222_v9  ;;  %v405_v33 = vmul.f32 %v2725_v6, %v2658_v35  ;;  %v413_v36 = vmul.f32 %v2668_v42, %v2622_v19  ;;  %v415_v31 = vmul.f32 %v2668_v42, %v2681_v48  ;;  %v419_v39 = vmul.f32 %v2684_v49, %v2670_v43 }
  0x72   : > { %v2226_v37 = vpack.c.bf16 %v446_v15, %v444_v14  ;;  %v397_v38 = vadd.f32 %v393_v11, %v387_v27  ;;  %v421_v40 = vmul.f32 %v2693_v54, %v2670_v43  ;;  %v399_v41 = vadd.f32 %v395_v12, %v389_v32  ;;  %v1009_v15 = vld [vmem:[%s3782_s4 + $0x10] sm:$0xff]  ;;  %v519_v27 = vld [vmem:[%s3781_s3] sm:$0xff]  ;;  %1028 = vperm.xlu1 %2336, %v1010_v10  }
  0x73   : > { %v429_v44 = vmul.f32 %v2696_v55, %v2687_v52  ;;  %v431_v45 = vmul.f32 %v2703_v60, %v2687_v52  ;;  %v439_v46 = vmul.f32 %v2718_v3, %v2690_v53  ;;  %v423_v51 = vadd.f32 %v419_v39, %v413_v36  ;;  %1023 = vperm.xlu0 %2335, %v1009_v15  }
  0x74   : > { %2227 = vmatprep.subr.bf16.mxu1 %v2226_v37  ;;  %v407_v50 = vadd.f32 %v403_v28, %v397_v38  ;;  %v425_v56 = vadd.f32 %v421_v40, %v415_v31  ;;  %v441_v57 = vmul.f32 %v2725_v6, %v2690_v53  ;;  %v409_v59 = vadd.f32 %v405_v33, %v399_v41 }
  0x75   : > { %v2774_v61 = vstv %s2705_s18  ;;  %v2777_v62 = vstv %s2720_s23  ;;  %v2780_v63 = vstv %s2722_s29  ;;  %v433_v0 = vadd.f32 %v429_v44, %v423_v51  ;;  %s2802_s29 = sld [smem:[#allocation2 + $0x182]]  ;;  %s2175_s18 = sld [smem:[#allocation5 + $0x80]] }
  0x76   : > { %3880 = vst [vmem:[#allocation20_spill] sm:$0xff] %v2774_v61  ;;  %3881 = vst [vmem:[#allocation21_spill] sm:$0xff] %v2777_v62  ;;  %v435_v1 = vadd.f32 %v431_v45, %v425_v56  ;;  %v450_v2 = vmul.f32 %v2774_v61, %v2612_v17  ;;  %v452_v4 = vmul.f32 %v2774_v61, %v2615_v18  ;;  %v2800_v14 = vstv %s2742_s9  ;;  %v2182_v45 = vld [vmem:[%s3782_s4 + $0x38] sm:$0xff]  ;;  %s2183_s23 = sld [smem:[#allocation5 + $0x100]]  ;;  %s2193_s9 = sld [smem:[#allocation5 + $0x182]] }
  0x77   : > { %3882 = vst [vmem:[#allocation22_spill] sm:$0xff] %v2780_v63  ;;  %v2224_v5 = vpack.c.bf16 %v409_v59, %v407_v50  ;;  %v456_v7 = vmul.f32 %v2625_v20, %v2777_v62  ;;  %v458_v8 = vmul.f32 %v2628_v21, %v2777_v62  ;;  %v466_v9 = vmul.f32 %v2631_v22, %v2780_v63  ;;  %v520_v59 = vld [vmem:[%s3781_s3 + $0x8] sm:$0xff] }
  0x78   : > { %v443_v11 = vadd.f32 %v439_v46, %v433_v0  ;;  %v445_v12 = vadd.f32 %v441_v57, %v435_v1  ;;  %v468_v13 = vmul.f32 %v2634_v23, %v2780_v63  ;;  %3883 = vst [vmem:[#allocation23_spill] sm:$0xff] %v2800_v14  ;;  %v476_v32 = vmul.f32 %v2637_v24, %v2800_v14  ;;  %v2148_v46 = vld [vmem:[%s3781_s3 + $0x20] sm:$0xff] }
  0x79   : > { %2225 = vmatpush1.bf16.msra.mxu0 %v2224_v5  ;;  %v460_v28 = vadd.f32 %v456_v7, %v450_v2  ;;  %v462_v29 = vadd.f32 %v458_v8, %v452_v4  ;;  %v478_v33 = vmul.f32 %v2640_v25, %v2800_v14  ;;  %v449_v31 = vmul.f32 %v2774_v61, %v2622_v19 }
  0x7a   : > { %v2228_v36 = vpack.c.bf16 %v445_v12, %v443_v11  ;;  %v451_v37 = vmul.f32 %v2774_v61, %v2681_v48  ;;  %v455_v38 = vmul.f32 %v2684_v49, %v2777_v62  ;;  %v457_v41 = vmul.f32 %v2693_v54, %v2777_v62  ;;  %1133 = vperm.xlu1 %2336, %v2182_v45  }
  0x7b   : > { %v470_v39 = vadd.f32 %v466_v9, %v460_v28  ;;  %v472_v40 = vadd.f32 %v468_v13, %v462_v29  ;;  %v465_v44 = vmul.f32 %v2696_v55, %v2780_v63  ;;  %v467_v50 = vmul.f32 %v2703_v60, %v2780_v63 }
  0x7c   : > { %2229 = vmatpush1.bf16.msra.mxu1 %v2228_v36  ;;  %2144 = vmatmul.mubr.msk.f32.vlgmr.msra.gmra.mrb[0].mxu0 %vm523_vm0, %v519_v27  ;;  %v459_v47 = vadd.f32 %v455_v38, %v449_v31  ;;  %v475_v51 = vmul.f32 %v2718_v3, %v2800_v14  ;;  %v2838_v56 = vstv %s2768_s11  ;;  %v461_v0 = vadd.f32 %v457_v41, %v451_v37  ;;  %s2172_s11 = sld [smem:[#allocation5 + $0x1]] }
  0x7d   : > { %3884 = vst [vmem:[#allocation24_spill] sm:$0xff] %v2838_v56  ;;  %606 = vmatprep.mubr.f32.mxu0 %v3789_v16  ;;  %v480_v57 = vadd.f32 %v476_v32, %v470_v39  ;;  %v482_v58 = vadd.f32 %v478_v33, %v472_v40  ;;  %v477_v1 = vmul.f32 %v2725_v6, %v2800_v14  ;;  %v2851_v7 = vstv %s2786_s8  ;;  %s2184_s8 = sld [smem:[#allocation5 + $0x101]] }
  0x7e   : > { %v469_v2 = vadd.f32 %v465_v44, %v459_v47  ;;  %v486_v4 = vmul.f32 %v2838_v56, %v2612_v17  ;;  %v488_v5 = vmul.f32 %v2838_v56, %v2615_v18  ;;  %3885 = vst [vmem:[#allocation25_spill] sm:$0xff] %v2851_v7  ;;  %v471_v9 = vadd.f32 %v467_v50, %v461_v0  ;;  %v2149_v17 = vld [vmem:[%s3781_s3 + $0x28] sm:$0xff]  ;;  %v2156_v0 = vld [vmem:[%s3781_s3 + $0x40] sm:$0xff] }
  0x7f   : > { %2152 = vmatmul.mubr.msk.f32.vlgmr.msra.gmra.mrb[0].mxu1 %vm523_vm0, %v2148_v46  ;;  %v2230_v8 = vpack.c.bf16 %v482_v58, %v480_v57  ;;  %v492_v10 = vmul.f32 %v2625_v20, %v2851_v7  ;;  %v494_v11 = vmul.f32 %v2628_v21, %v2851_v7  ;;  %v2864_v12 = vstv %s2802_s29  ;;  %v522_v46 = vld [vmem:[%s3781_s3 + $0x18] sm:$0xff]  ;;  %v2195_v57 = vld [vmem:[%s3782_s4 + $0x60] sm:$0xff]  ;;  %s2192_s29 = sld [smem:[#allocation5 + $0x181]] }
  0x80   : > { %712 = vmatprep.mubr.f32.mxu1 %v3789_v16  ;;  %2145 = vmatmul.mubr.msk.f32.gmra.mrb[2].mxu0 %vm523_vm0, %v520_v59  ;;  %v479_v18 = vadd.f32 %v475_v51, %v469_v2  ;;  %3886 = vst [vmem:[#allocation26_spill] sm:$0xff] %v2864_v12  ;;  %v2867_v13 = vstv %s2804_s22  ;;  %v485_v15 = vmul.f32 %v2838_v56, %v2622_v19  ;;  %v2190_v58 = vld [vmem:[%s3782_s4 + $0x58] sm:$0xff]  ;;  %v2189_v2 = vld [vmem:[%s3782_s4 + $0x50] sm:$0xff]  ;;  %s2173_s22 = sld [smem:[#allocation5 + $0x2]] }
  0x81   : > { %3887 = vst [vmem:[#allocation27_spill] sm:$0xff] %v2867_v13  ;;  %2231 = vmatprep.subr.bf16.mxu0 %v2230_v8  ;;  %v481_v20 = vadd.f32 %v477_v1, %v471_v9  ;;  %v496_v27 = vadd.f32 %v492_v10, %v486_v4  ;;  %v498_v21 = vadd.f32 %v494_v11, %v488_v5  ;;  %v2164_v1 = vld [vmem:[%s3781_s3 + $0x60] sm:$0xff]  ;;  %v2198_v4 = vld [vmem:[%s3782_s4 + $0x78] sm:$0xff]  ;;  %v2157_v5 = vld [vmem:[%s3781_s3 + $0x48] sm:$0xff] }
  0x82   : > { %v502_v28 = vmul.f32 %v2631_v22, %v2864_v12  ;;  %v504_v29 = vmul.f32 %v2634_v23, %v2864_v12  ;;  %v512_v32 = vmul.f32 %v2637_v24, %v2867_v13  ;;  %v514_v33 = vmul.f32 %v2640_v25, %v2867_v13  ;;  %612 = vmatprep.mubr.f32.mxu0 %v3789_v16  ;;  %v521_v24 = vld [vmem:[%s3781_s3 + $0x10] sm:$0xff]  ;;  %v2165_v8 = vld [vmem:[%s3781_s3 + $0x68] sm:$0xff] }
  0x83   : > { %v487_v36 = vmul.f32 %v2838_v56, %v2681_v48  ;;  %2153 = vmatmul.mubr.msk.f32.gmra.mrb[2].mxu1 %vm523_vm0, %v2149_v17  ;;  %v2232_v19 = vpack.c.bf16 %v481_v20, %v479_v18  ;;  %v491_v22 = vmul.f32 %v2684_v49, %v2851_v7  ;;  %v493_v23 = vmul.f32 %v2693_v54, %v2851_v7  ;;  %v2181_v25 = vld [vmem:[%s3782_s4 + $0x30] sm:$0xff]  ;;  %v2206_v10 = vld [vmem:[%s3784_s6 + $0x8] sm:$0xff]  ;;  %v1904_v18 = vld [vmem:[%s3784_s6] sm:$0xff] }
  0x84   : > { %v506_v31 = vadd.f32 %v502_v28, %v496_v27  ;;  %v508_v48 = vadd.f32 %v504_v29, %v498_v21  ;;  %v501_v37 = vmul.f32 %v2696_v55, %v2864_v12  ;;  %v503_v38 = vmul.f32 %v2703_v60, %v2864_v12  ;;  %718 = vmatprep.mubr.f32.mxu1 %v3789_v16  ;;  %v2150_v54 = vld [vmem:[%s3781_s3 + $0x30] sm:$0xff]  ;;  %v2196_v55 = vld [vmem:[%s3782_s4 + $0x68] sm:$0xff]  ;;  %v2159_v20 = vld [vmem:[%s3781_s3 + $0x58] sm:$0xff] }
  0x85   : > { %v511_v49 = vmul.f32 %v2718_v3, %v2867_v13  ;;  %2233 = vmatpush1.bf16.msra.mxu0 %v2232_v19  ;;  %v495_v40 = vadd.f32 %v491_v22, %v485_v15  ;;  %v497_v41 = vadd.f32 %v493_v23, %v487_v36  ;;  %v513_v44 = vmul.f32 %v2725_v6, %v2867_v13  ;;  %v2151_v6 = vld [vmem:[%s3781_s3 + $0x38] sm:$0xff]  ;;  %v2197_v9 = vld [vmem:[%s3782_s4 + $0x70] sm:$0xff] }
  0x86   : > { %v516_v39 = vadd.f32 %v512_v32, %v506_v31  ;;  %v518_v60 = vadd.f32 %v514_v33, %v508_v48  ;;  %2146 = vmatmul.mubr.msk.f32.gmra.mrb[4].mxu0 %vm523_vm0, %v521_v24  ;;  %1128 = vperm.xlu0 %2335, %v2181_v25   ;;  %v2158_v11 = vld [vmem:[%s3781_s3 + $0x50] sm:$0xff]  ;;  %v2208_v15 = vld [vmem:[%s3784_s6 + $0x18] sm:$0xff]  ;;  %v2989_v28 = vstv %s943_s14  ;;  %v2991_v29 = vstv %s2175_s18 }
  0x87   : > { %v505_v3 = vadd.f32 %v501_v37, %v495_v40  ;;  %v507_v45 = vadd.f32 %v503_v38, %v497_v41  ;;  %2154 = vmatmul.mubr.msk.f32.gmra.mrb[4].mxu1 %vm523_vm0, %v2150_v54  ;;  %618 = vmatprep.mubr.f32.mxu0 %v3789_v16  ;;  %v2166_v17 = vld [vmem:[%s3781_s3 + $0x70] sm:$0xff]  ;;  %v2167_v27 = vld [vmem:[%s3781_s3 + $0x78] sm:$0xff]  ;;  %3888 = vst [vmem:[#allocation28_spill] sm:$0xff] %v2989_v28  ;;  %3889 = vst [vmem:[#allocation29_spill] sm:$0xff] %v2991_v29  ;;  %v2993_v32 = vstv %s2183_s23 }
  0x88   : > { %v2234_v47 = vpack.c.bf16 %v518_v60, %v516_v39  ;;  %724 = vmatprep.mubr.f32.mxu1 %v3789_v16  ;;  %1333 = vperm.xlu1 %2336, %v2196_v55   ;;  %v2207_v21 = vld [vmem:[%s3784_s6 + $0x10] sm:$0xff]  ;;  %3890 = vst [vmem:[#allocation30_spill] sm:$0xff] %v2993_v32  ;;  %v2995_v33 = vstv %s2191_s15  ;;  %v2997_v36 = vstv %s2172_s11  ;;  %v2999_v19 = vstv %s2176_s16  ;;  %s2116_s16 = sshll.u32 %s2604_s20, 6 }
  0x89   : > { %v515_v50 = vadd.f32 %v511_v49, %v505_v3  ;;  %v517_v51 = vadd.f32 %v513_v44, %v507_v45  ;;  %3891 = vst [vmem:[#allocation31_spill] sm:$0xff] %v2995_v33  ;;  %3892 = vst [vmem:[#allocation32_spill] sm:$0xff] %v2997_v36  ;;  %v3001_v31 = vstv %s2184_s8  ;;  %v3003_v22 = vstv %s2192_s29  ;;  %s2221_s8 = sshll.u32 %s2508_s28, 8  ;;  %s353_s29 = scalar_lea.vmem [#allocation8], %s2116_s16 }
  0x8a   : > { %2235 = vmatprep.subr.bf16.mxu1 %v2234_v47  ;;  %2147 = vmatmul.mubr.msk.f32.gmra.mrb[6].mxu0 %vm523_vm0, %v522_v46  ;;  %3893 = vst [vmem:[#allocation33_spill] sm:$0xff] %v2999_v19  ;;  %3894 = vst [vmem:[#allocation34_spill] sm:$0xff] %v3001_v31  ;;  %v3005_v24 = vstv %s2173_s22  ;;  %v3007_v25 = vstv %s2177_s17  ;;  %v3009_v48 = vstv %s2185_s19  ;;  %v3011_v37 = vstv %s2193_s9  ;;  %s2014_s22 = sshll.u32 %s353_s29, 4  ;;  %s3732_s28 = scalar_lea.hbm %s3785_s7, %s2221_s8  ;;  %s3734_s22 = int_to_ptr.vmem [resolvable:$true] %s2014_s22 }
  0x8b   : > { %v2236_v59 = vpack.c.bf16 %v517_v51, %v515_v50  ;;  %2155 = vmatmul.mubr.msk.f32.gmra.mrb[6].mxu1 %vm523_vm0, %v2151_v6  ;;  %812 = vmatprep.mubr.f32.mxu0 %v3789_v16  ;;  %3895 = vst [vmem:[#allocation35_spill] sm:$0xff] %v3003_v22  ;;  %3896 = vst [vmem:[#allocation36_spill] sm:$0xff] %v3007_v25  ;;  %v3013_v49 = vstv %s2174_s21  ;;  %v3015_v54 = vstv %s2178_s0  ;;  %v3017_v39 = vstv %s2186_s1  ;;  %s2001_s9 = scalar_lea.sflag [#allocation3], %s2604_s20  ;;  %s2367_s21 = scalar_lea.vmem %s3734_s22, 1024 }
  0x8c   : > { %918 = vmatprep.mubr.f32.mxu1 %v3789_v16  ;;  %1328 = vperm.xlu0 %2335, %v2195_v57   ;;  %3897 = vst [vmem:[#allocation37_spill] sm:$0xff] %v3009_v48  ;;  %3898 = vst [vmem:[#allocation38_spill] sm:$0xff] %v3011_v37  ;;  %v3019_v40 = vstv %s2194_s2  ;;  %p2368_p2 = scmp.ne.s32.totalorder %s3734_s22, %s2367_s21  ;;  %s2443_s0 = smov [#allocation8]  }
  0x8d   : > { %2237 = vmatpush1.bf16.msra.mxu1 %v2236_v59  ;;  %1238 = vperm.xlu1 %2336, %v2190_v58   ;;  %3899 = vst [vmem:[#allocation39_spill] sm:$0xff] %v3013_v49  ;;  %3900 = vst [vmem:[#allocation40_spill] sm:$0xff] %v3015_v54  ;;  %s2371_s1 = sshll.u32 %s2443_s0, 4  ;;  %s2372_s1 = int_to_ptr.vmem [resolvable:$false] %s2371_s1 }
  0x8e   : > { %2160 = vmatmul.mubr.msk.f32.vlgmr.msra.gmra.mrb[8].mxu0 %vm523_vm0, %v2156_v0  ;;  %3901 = vst [vmem:[#allocation41_spill] sm:$0xff] %v3017_v39  ;;  %3902 = vst [vmem:[#allocation42_spill] sm:$0xff] %v3019_v40  ;;  %p2369_p8 = pnand %p2368_p2, %p3963_p7  ;;  %s2373_s2 = scalar_lea.vmem %s2372_s1, 2048 }
  0x8f   : > { %818 = vmatprep.mubr.f32.mxu0 %v3789_v16  ;;  %p2374_p13 = scmp.lt.s32.totalorder %s3734_s22, %s2372_s1  ;;  %p2375_p1 = scmp.lt.s32.totalorder %s2373_s2, %s2367_s21 }
  0x90   : > { %2168 = vmatmul.mubr.msk.f32.vlgmr.msra.gmra.mrb[8].mxu1 %vm523_vm0, %v2164_v1  ;;  %1233 = vperm.xlu0 %2335, %v2189_v2   ;;  %p2370_p9 = pneg %p2369_p8 }
  0x91   : > { %924 = vmatprep.mubr.f32.mxu1 %v3789_v16  ;;  %1343 = vperm.xlu1 %2336, %v2198_v4   ;;  %p2376_p3 = por %p2375_p1, %p2374_p13 }
  0x92   : > { %2161 = vmatmul.mubr.msk.f32.gmra.mrb[10].mxu0 %vm523_vm0, %v2157_v5 }
  0x93   : > { %824 = vmatprep.mubr.f32.mxu0 %v3789_v16  ;;  %p2377_p4 = pnand %p2376_p3, %p2370_p9 }
  0x94   : > { %2169 = vmatmul.mubr.msk.f32.gmra.mrb[10].mxu1 %vm523_vm0, %v2165_v8  ;;  %1338 = vperm.xlu0 %2335, %v2197_v9  }
  0x95   : > { %930 = vmatprep.mubr.f32.mxu1 %v3789_v16  ;;  %1932 = vperm.xlu1 %2336, %v2206_v10  }
  0x96   : > { %2162 = vmatmul.mubr.msk.f32.gmra.mrb[12].mxu0 %vm523_vm0, %v2158_v11 }
  0x97   : > { %830 = vmatprep.mubr.f32.mxu0 %v3789_v16 }
  0x98   : > { %2170 = vmatmul.mubr.msk.f32.gmra.mrb[12].mxu1 %vm523_vm0, %v2166_v17  ;;  %1907 = vperm.xlu0 %2335, %v1904_v18  }
  0x99   : > { %936 = vmatprep.mubr.f32.mxu1 %v3789_v16  ;;  %1982 = vperm.xlu1 %2336, %v2208_v15  }
  0x9a   : > { %2163 = vmatmul.mubr.msk.f32.gmra.mrb[14].mxu0 %vm523_vm0, %v2159_v20 }
  0x9b   : > { %1655 = vmatprep.mubr.f32.mxu0 %v3789_v16 }
  0x9c   : > { %2171 = vmatmul.mubr.msk.f32.gmra.mrb[14].mxu1 %vm523_vm0, %v2167_v27  ;;  %1957 = vperm.xlu0 %2335, %v2207_v21  }
  0x9d   : > { %1731 = vmatprep.mubr.f32.mxu1 %v3789_v16 }
  0xe4   : > { %v3081_v56 = vpop.permute.xlu1 %1118 }
  0xe6   : > { %v3021_v41 = vpop.permute.xlu0 %1013 }
  0xe8   : > { %v3117_v26 = vpop.permute.xlu1 %1123 }
  0xe9   : > { %3907 = vst [vmem:[#allocation47_spill] sm:$0xff] %v3117_v26 }
 0x14f   : > { %v602_v23 = vpop.f32.mrb[0].mxu0 }
 0x150   : > { %v604_v38 = vpop.f32.mrb[1].mxu0  ;;  %v945_v44 = vmul.f32 %v2989_v28, %v602_v23  ;;  %v1049_v55 = vmul.f32 %v2991_v29, %v602_v23  ;;  %v1154_v60 = vmul.f32 %v2993_v32, %v602_v23  ;;  %v1259_v3 = vmul.f32 %v2995_v33, %v602_v23 }
 0x151   : > { %v946_v46 = vmul.f32 %v2989_v28, %v604_v38  ;;  %v1050_v47 = vmul.f32 %v2991_v29, %v604_v38  ;;  %v1155_v6 = vmul.f32 %v2993_v32, %v604_v38  ;;  %v1260_v50 = vmul.f32 %v2995_v33, %v604_v38  ;;  %v3055_v38 = vpop.permute.xlu0 %1018 }
 0x152   : > { %v708_v45 = vpop.f32.mrb[0].mxu1 }
 0x153   : > { %v955_v51 = vmul.f32 %v2997_v36, %v708_v45  ;;  %v1059_v57 = vmul.f32 %v2999_v19, %v708_v45  ;;  %v1164_v58 = vmul.f32 %v3001_v31, %v708_v45  ;;  %v1269_v59 = vmul.f32 %v3003_v22, %v708_v45  ;;  %v710_v0 = vpop.f32.mrb[1].mxu1  ;;  %v608_v1 = vpop.f32.mrb[2].mxu0 }
 0x154   : > { %v956_v2 = vmul.f32 %v2997_v36, %v710_v0  ;;  %v1060_v4 = vmul.f32 %v2999_v19, %v710_v0  ;;  %v1165_v5 = vmul.f32 %v3001_v31, %v710_v0  ;;  %v1270_v8 = vmul.f32 %v3003_v22, %v710_v0  ;;  %v610_v9 = vpop.f32.mrb[3].mxu0 }
 0x155   : > { %v3039_v10 = vadd.f32 %v955_v51, %v945_v44  ;;  %v3041_v11 = vadd.f32 %v1059_v57, %v1049_v55  ;;  %v3043_v17 = vadd.f32 %v1164_v58, %v1154_v60  ;;  %v3045_v18 = vadd.f32 %v1269_v59, %v1259_v3 }
 0x156   : > { %v3047_v15 = vadd.f32 %v956_v2, %v946_v46  ;;  %v3049_v20 = vadd.f32 %v1060_v4, %v1050_v47  ;;  %v3051_v27 = vadd.f32 %v1165_v5, %v1155_v6  ;;  %v3053_v21 = vadd.f32 %v1270_v8, %v1260_v50  ;;  %v714_v23 = vpop.f32.mrb[2].mxu1 }
 0x157   : > { %v947_v44 = vmul.f32 %v2989_v28, %v608_v1  ;;  %v1051_v55 = vmul.f32 %v2991_v29, %v608_v1  ;;  %v1156_v60 = vmul.f32 %v2993_v32, %v608_v1  ;;  %v1261_v3 = vmul.f32 %v2995_v33, %v608_v1  ;;  %v716_v45 = vpop.f32.mrb[3].mxu1 }
 0x158   : > { %v957_v46 = vmul.f32 %v2997_v36, %v714_v23  ;;  %v1061_v47 = vmul.f32 %v2999_v19, %v714_v23  ;;  %v1166_v6 = vmul.f32 %v3001_v31, %v714_v23  ;;  %v1271_v50 = vmul.f32 %v3003_v22, %v714_v23 }
 0x159   : > { %v948_v51 = vmul.f32 %v2989_v28, %v610_v9  ;;  %v1052_v57 = vmul.f32 %v2991_v29, %v610_v9  ;;  %v1157_v58 = vmul.f32 %v2993_v32, %v610_v9  ;;  %v1262_v59 = vmul.f32 %v2995_v33, %v610_v9  ;;  %v614_v0 = vpop.f32.mrb[4].mxu0 }
 0x15a   : > { %v3069_v2 = vadd.f32 %v957_v46, %v947_v44  ;;  %v3071_v1 = vadd.f32 %v1061_v47, %v1051_v55  ;;  %v3073_v4 = vadd.f32 %v1166_v6, %v1156_v60  ;;  %v3075_v5 = vadd.f32 %v1271_v50, %v1261_v3  ;;  %v720_v8 = vpop.f32.mrb[4].mxu1  ;;  %v616_v16 = vpop.f32.mrb[5].mxu0 }
 0x15b   : > { %v958_v23 = vmul.f32 %v2997_v36, %v716_v45  ;;  %v1062_v13 = vmul.f32 %v2999_v19, %v716_v45  ;;  %v1167_v12 = vmul.f32 %v3001_v31, %v716_v45  ;;  %v1272_v7 = vmul.f32 %v3003_v22, %v716_v45  ;;  %v722_v9 = vpop.f32.mrb[5].mxu1  ;;  %v3087_v46 = vpop.permute.xlu0 %1223 }
 0x15c   : > { %v949_v44 = vmul.f32 %v2989_v28, %v614_v0  ;;  %v1053_v55 = vmul.f32 %v2991_v29, %v614_v0  ;;  %v1158_v60 = vmul.f32 %v2993_v32, %v614_v0  ;;  %v1263_v3 = vmul.f32 %v2995_v33, %v614_v0 }
 0x15d   : > { %v3089_v47 = vadd.f32 %v958_v23, %v948_v51  ;;  %v3091_v6 = vadd.f32 %v1062_v13, %v1052_v57  ;;  %v3093_v50 = vadd.f32 %v1167_v12, %v1157_v58  ;;  %v3095_v45 = vadd.f32 %v1272_v7, %v1262_v59  ;;  %v620_v14 = vpop.f32.mrb[6].mxu0 }
 0x15e   : > { %v959_v63 = vmul.f32 %v2997_v36, %v720_v8  ;;  %v1063_v62 = vmul.f32 %v2999_v19, %v720_v8  ;;  %v1168_v61 = vmul.f32 %v3001_v31, %v720_v8  ;;  %v1273_v53 = vmul.f32 %v3003_v22, %v720_v8  ;;  %v726_v0 = vpop.f32.mrb[6].mxu1  ;;  %v622_v52 = vpop.f32.mrb[7].mxu0 }
 0x15f   : > { %v950_v51 = vmul.f32 %v2989_v28, %v616_v16  ;;  %v1054_v13 = vmul.f32 %v2991_v29, %v616_v16  ;;  %v1159_v12 = vmul.f32 %v2993_v32, %v616_v16  ;;  %v1264_v7 = vmul.f32 %v2995_v33, %v616_v16  ;;  %v728_v57 = vpop.f32.mrb[7].mxu1 }
 0x160   : > { %v3105_v58 = vadd.f32 %v959_v63, %v949_v44  ;;  %v3107_v59 = vadd.f32 %v1063_v62, %v1053_v55  ;;  %v3109_v23 = vadd.f32 %v1168_v61, %v1158_v60  ;;  %v3111_v43 = vadd.f32 %v1273_v53, %v1263_v3  ;;  %v3123_v44 = vpop.permute.xlu0 %1023 }
 0x161   : > { %v960_v8 = vmul.f32 %v2997_v36, %v722_v9  ;;  %v1064_v42 = vmul.f32 %v2999_v19, %v722_v9  ;;  %v1169_v35 = vmul.f32 %v3001_v31, %v722_v9  ;;  %v1274_v34 = vmul.f32 %v3003_v22, %v722_v9  ;;  %v814_v30 = vpop.f32.mrb[8].mxu0  ;;  %3908 = vst [vmem:[#allocation48_spill] sm:$0xff] %v3123_v44 }
 0x162   : > { %3903 = vst [vmem:[#allocation43_spill] sm:$0xff] %v3105_v58  ;;  %3904 = vst [vmem:[#allocation44_spill] sm:$0xff] %v3107_v59  ;;  %v951_v16 = vmul.f32 %v2989_v28, %v620_v14  ;;  %v1055_v62 = vmul.f32 %v2991_v29, %v620_v14  ;;  %v1160_v61 = vmul.f32 %v2993_v32, %v620_v14  ;;  %v816_v63 = vpop.f32.mrb[9].mxu0 }
 0x163   : > { %3905 = vst [vmem:[#allocation45_spill] sm:$0xff] %v3109_v23  ;;  %3906 = vst [vmem:[#allocation46_spill] sm:$0xff] %v3111_v43  ;;  %v1265_v53 = vmul.f32 %v2995_v33, %v620_v14  ;;  %v3125_v55 = vadd.f32 %v960_v8, %v950_v51  ;;  %v3127_v60 = vadd.f32 %v1064_v42, %v1054_v13  ;;  %v920_v43 = vpop.f32.mrb[8].mxu1 }
 0x164   : > { %v3129_v3 = vadd.f32 %v1169_v35, %v1159_v12  ;;  %v3131_v9 = vadd.f32 %v1274_v34, %v1264_v7  ;;  %v961_v23 = vmul.f32 %v2997_v36, %v726_v0  ;;  %v1065_v59 = vmul.f32 %v2999_v19, %v726_v0  ;;  %v922_v26 = vpop.f32.mrb[9].mxu1 }
 0x165   : > { %v1170_v58 = vmul.f32 %v3001_v31, %v726_v0  ;;  %v1275_v14 = vmul.f32 %v3003_v22, %v726_v0  ;;  %v952_v44 = vmul.f32 %v2989_v28, %v622_v52  ;;  %v1056_v51 = vmul.f32 %v2991_v29, %v622_v52  ;;  %v3141_v34 = vpop.f32.mrb[10].mxu0 }
 0x166   : > { %v1161_v42 = vmul.f32 %v2993_v32, %v622_v52  ;;  %v1266_v35 = vmul.f32 %v2995_v33, %v622_v52  ;;  %v3143_v13 = vadd.f32 %v961_v23, %v951_v16  ;;  %v3145_v12 = vadd.f32 %v1065_v59, %v1055_v62  ;;  %v3151_v0 = vpop.f32.mrb[11].mxu0  ;;  %v3159_v23 = vpop.permute.xlu1 %1228 }
 0x167   : > { %v3147_v7 = vadd.f32 %v1170_v58, %v1160_v61  ;;  %v3149_v8 = vadd.f32 %v1275_v14, %v1265_v53  ;;  %v962_v28 = vmul.f32 %v2997_v36, %v728_v57  ;;  %v1066_v29 = vmul.f32 %v2999_v19, %v728_v57  ;;  %v3157_v33 = vpop.f32.mrb[10].mxu1  ;;  %v3167_v53 = vpop.permute.xlu0 %1128 }
 0x168   : > { %3909 = vst [vmem:[#allocation49_spill] sm:$0xff] %v3143_v13  ;;  %3910 = vst [vmem:[#allocation50_spill] sm:$0xff] %v3145_v12  ;;  %v1171_v32 = vmul.f32 %v3001_v31, %v728_v57  ;;  %v1276_v52 = vmul.f32 %v3003_v22, %v728_v57  ;;  %v973_v59 = vmul.f32 %v3005_v24, %v814_v30  ;;  %v3165_v61 = vpop.f32.mrb[11].mxu1 }
 0x169   : > { %3911 = vst [vmem:[#allocation51_spill] sm:$0xff] %v3147_v7  ;;  %3912 = vst [vmem:[#allocation52_spill] sm:$0xff] %v3149_v8  ;;  %v1077_v58 = vmul.f32 %v3007_v25, %v814_v30  ;;  %v1182_v16 = vmul.f32 %v3009_v48, %v814_v30  ;;  %v1287_v62 = vmul.f32 %v3011_v37, %v814_v30  ;;  %v3177_v19 = vpop.f32.mrb[12].mxu0 }
 0x16a   : > { %v3169_v14 = vadd.f32 %v962_v28, %v952_v44  ;;  %v3171_v31 = vadd.f32 %v1066_v29, %v1056_v51  ;;  %v3173_v57 = vadd.f32 %v1171_v32, %v1161_v42  ;;  %v3175_v22 = vadd.f32 %v1276_v52, %v1266_v35  ;;  %v3183_v12 = vpop.f32.mrb[13].mxu0 }
 0x16b   : > { %v981_v36 = vadd.f32 %v973_v59, %v3039_v10  ;;  %v1085_v8 = vadd.f32 %v1077_v58, %v3041_v11  ;;  %v1190_v30 = vadd.f32 %v1182_v16, %v3043_v17  ;;  %v1295_v7 = vadd.f32 %v1287_v62, %v3045_v18  ;;  %v3189_v51 = vpop.f32.mrb[12].mxu1  ;;  %v3203_v16 = vpop.permute.xlu1 %1028 }
 0x16c   : > { %3913 = vst [vmem:[#allocation53_spill] sm:$0xff] %v3169_v14  ;;  %3914 = vst [vmem:[#allocation54_spill] sm:$0xff] %v3171_v31  ;;  %v974_v28 = vmul.f32 %v3005_v24, %v816_v63  ;;  %v1078_v29 = vmul.f32 %v3007_v25, %v816_v63  ;;  %v1183_v32 = vmul.f32 %v3009_v48, %v816_v63  ;;  %v3195_v42 = vpop.f32.mrb[13].mxu1 }
 0x16d   : > { %3915 = vst [vmem:[#allocation55_spill] sm:$0xff] %v3173_v57  ;;  %3916 = vst [vmem:[#allocation56_spill] sm:$0xff] %v3175_v22  ;;  %v1288_v44 = vmul.f32 %v3011_v37, %v816_v63  ;;  %v991_v10 = vmul.f32 %v3013_v49, %v920_v43  ;;  %v1095_v11 = vmul.f32 %v3015_v54, %v920_v43  ;;  %v3201_v58 = vpop.f32.mrb[14].mxu0 }
 0x16e   : > { %v1200_v17 = vmul.f32 %v3017_v39, %v920_v43  ;;  %v1305_v18 = vmul.f32 %v3019_v40, %v920_v43  ;;  %v982_v35 = vadd.f32 %v974_v28, %v3047_v15  ;;  %v1086_v52 = vadd.f32 %v1078_v29, %v3049_v20  ;;  %v3205_v14 = vpop.f32.mrb[15].mxu0  ;;  %v1329_v43 = vpop.permute.xlu0 %1328 }
 0x16f   : > { %v1191_v59 = vadd.f32 %v1183_v32, %v3051_v27  ;;  %v1296_v63 = vadd.f32 %v1288_v44, %v3053_v21  ;;  %v999_v62 = vadd.f32 %v991_v10, %v981_v36  ;;  %v1103_v22 = vadd.f32 %v1095_v11, %v1085_v8  ;;  %v3211_v21 = vpop.f32.mrb[14].mxu1 }
 0x170   : > { %v1208_v57 = vadd.f32 %v1200_v17, %v1190_v30  ;;  %v1313_v31 = vadd.f32 %v1305_v18, %v1295_v7  ;;  %v992_v13 = vmul.f32 %v3013_v49, %v922_v26  ;;  %v1096_v15 = vmul.f32 %v3015_v54, %v922_v26  ;;  %v3216_v30 = vpop.f32.mrb[15].mxu1 }
 0x171   : > { %v1201_v20 = vmul.f32 %v3017_v39, %v922_v26  ;;  %v1306_v27 = vmul.f32 %v3019_v40, %v922_v26  ;;  %v1031_v28 = vadd.f32 %v3021_v41, %v999_v62  ;;  %v1136_v36 = vadd.f32 %v3081_v56, %v1103_v22 }
 0x172   : > { %v1241_v8 = vadd.f32 %v3087_v46, %v1208_v57  ;;  %v1346_v7 = vadd.f32 %v1329_v43, %v1313_v31  ;;  %v1000_v29 = vadd.f32 %v992_v13, %v982_v35  ;;  %v1104_v32 = vadd.f32 %v1096_v15, %v1086_v52 }
 0x173   : > { %v1209_v44 = vadd.f32 %v1201_v20, %v1191_v59  ;;  %v1314_v10 = vadd.f32 %v1306_v27, %v1296_v63  ;;  %v3218_v11 = vmax.f32 %v1031_v28, 0.0  ;;  %v3220_v17 = vmax.f32 %v1136_v36, 0.0  ;;  %v3237_v63 = vpop.permute.xlu1 %1133 }
 0x174   : > { %v3222_v26 = vmax.f32 %v1241_v8, 0.0  ;;  %v3224_v18 = vmax.f32 %v1346_v7, 0.0  ;;  %v1032_v62 = vadd.f32 %v3021_v41, %v1000_v29  ;;  %v1137_v22 = vadd.f32 %v3081_v56, %v1104_v32 }
 0x175   : > { %v1242_v31 = vadd.f32 %v3087_v46, %v1209_v44  ;;  %v1347_v57 = vadd.f32 %v1329_v43, %v1314_v10  ;;  %v975_v13 = vmul.f32 %v3005_v24, %v3141_v34  ;;  %v1079_v35 = vmul.f32 %v3007_v25, %v3141_v34 }
 0x176   : > { %v1184_v52 = vmul.f32 %v3009_v48, %v3141_v34  ;;  %v1289_v59 = vmul.f32 %v3011_v37, %v3141_v34  ;;  %v3239_v41 = vmax.f32 %v1032_v62, 0.0  ;;  %v3241_v56 = vmax.f32 %v1137_v22, 0.0 }
 0x177   : > { %v3243_v46 = vmax.f32 %v1242_v31, 0.0  ;;  %v3245_v43 = vmax.f32 %v1347_v57, 0.0  ;;  %v983_v15 = vadd.f32 %v975_v13, %v3069_v2  ;;  %v1087_v20 = vadd.f32 %v1079_v35, %v3071_v1  ;;  %v1334_v57 = vpop.permute.xlu1 %1333 }
 0x178   : > { %v1192_v27 = vadd.f32 %v1184_v52, %v3073_v4  ;;  %v1297_v28 = vadd.f32 %v1289_v59, %v3075_v5  ;;  %v976_v34 = vmul.f32 %v3005_v24, %v3151_v0  ;;  %v1080_v36 = vmul.f32 %v3007_v25, %v3151_v0 }
 0x179   : > { %v1185_v8 = vmul.f32 %v3009_v48, %v3151_v0  ;;  %v1290_v7 = vmul.f32 %v3011_v37, %v3151_v0  ;;  %v993_v2 = vmul.f32 %v3013_v49, %v3157_v33  ;;  %v1097_v1 = vmul.f32 %v3015_v54, %v3157_v33 }
 0x17a   : > { %v1202_v4 = vmul.f32 %v3017_v39, %v3157_v33  ;;  %v1307_v5 = vmul.f32 %v3019_v40, %v3157_v33  ;;  %v984_v29 = vadd.f32 %v976_v34, %v3089_v47  ;;  %v1088_v32 = vadd.f32 %v1080_v36, %v3091_v6 }
 0x17b   : > { %v1193_v44 = vadd.f32 %v1185_v8, %v3093_v50  ;;  %v1298_v0 = vadd.f32 %v1290_v7, %v3095_v45  ;;  %v1001_v10 = vadd.f32 %v993_v2, %v983_v15  ;;  %v1105_v62 = vadd.f32 %v1097_v1, %v1087_v20  ;;  %v3917_v50 = vld [vmem:[#allocation47_spill] sm:$0xff] }
 0x17c   : > { %v1210_v22 = vadd.f32 %v1202_v4, %v1192_v27  ;;  %v1315_v31 = vadd.f32 %v1307_v5, %v1297_v28  ;;  %v994_v13 = vmul.f32 %v3013_v49, %v3165_v61  ;;  %v1098_v35 = vmul.f32 %v3015_v54, %v3165_v61 }
 0x17d   : > { %v1203_v33 = vmul.f32 %v3017_v39, %v3165_v61  ;;  %v1308_v47 = vmul.f32 %v3019_v40, %v3165_v61  ;;  %v1033_v6 = vadd.f32 %v3055_v38, %v1001_v10  ;;  %v1138_v45 = vadd.f32 %v3917_v50, %v1105_v62 }
 0x17e   : > { %v1243_v52 = vadd.f32 %v3159_v23, %v1210_v22  ;;  %v1348_v59 = vadd.f32 %v1334_v57, %v1315_v31  ;;  %v1002_v15 = vadd.f32 %v994_v13, %v984_v29  ;;  %v1106_v20 = vadd.f32 %v1098_v35, %v1088_v32  ;;  %v3918_v22 = vld [vmem:[#allocation43_spill] sm:$0xff]  ;;  %v3920_v35 = vld [vmem:[#allocation45_spill] sm:$0xff] }
 0x17f   : > { %v1211_v27 = vadd.f32 %v1203_v33, %v1193_v44  ;;  %v1316_v28 = vadd.f32 %v1308_v47, %v1298_v0  ;;  %v3282_v34 = vmax.f32 %v1033_v6, 0.0  ;;  %v3284_v36 = vmax.f32 %v1138_v45, 0.0  ;;  %v1234_v0 = vpop.permute.xlu0 %1233  ;;  %v3921_v47 = vld [vmem:[#allocation46_spill] sm:$0xff] }
 0x180   : > { %v3286_v8 = vmax.f32 %v1243_v52, 0.0  ;;  %v3288_v7 = vmax.f32 %v1348_v59, 0.0  ;;  %v1034_v61 = vadd.f32 %v3055_v38, %v1002_v15  ;;  %v1139_v2 = vadd.f32 %v3917_v50, %v1106_v20 }
 0x181   : > { %v1244_v1 = vadd.f32 %v3159_v23, %v1211_v27  ;;  %v1349_v4 = vadd.f32 %v1334_v57, %v1316_v28  ;;  %v977_v5 = vmul.f32 %v3005_v24, %v3177_v19  ;;  %v1081_v29 = vmul.f32 %v3007_v25, %v3177_v19  ;;  %v3919_v57 = vld [vmem:[#allocation44_spill] sm:$0xff] }
 0x182   : > { %v1186_v32 = vmul.f32 %v3009_v48, %v3177_v19  ;;  %v1291_v44 = vmul.f32 %v3011_v37, %v3177_v19  ;;  %v3301_v10 = vmax.f32 %v1034_v61, 0.0  ;;  %v3303_v38 = vmax.f32 %v1139_v2, 0.0 }
 0x183   : > { %v3305_v62 = vmax.f32 %v1244_v1, 0.0  ;;  %v3307_v23 = vmax.f32 %v1349_v4, 0.0  ;;  %v985_v31 = vadd.f32 %v977_v5, %v3918_v22  ;;  %v1089_v13 = vadd.f32 %v1081_v29, %v3919_v57 }
 0x184   : > { %v1194_v33 = vadd.f32 %v1186_v32, %v3920_v35  ;;  %v1299_v6 = vadd.f32 %v1291_v44, %v3921_v47  ;;  %v978_v19 = vmul.f32 %v3005_v24, %v3183_v12  ;;  %v1082_v50 = vmul.f32 %v3007_v25, %v3183_v12  ;;  %v1339_v32 = vpop.permute.xlu0 %1338 }
 0x185   : > { %v1187_v45 = vmul.f32 %v3009_v48, %v3183_v12  ;;  %v1292_v52 = vmul.f32 %v3011_v37, %v3183_v12  ;;  %v995_v59 = vmul.f32 %v3013_v49, %v3189_v51  ;;  %v1099_v15 = vmul.f32 %v3015_v54, %v3189_v51 }
 0x186   : > { %v1204_v20 = vmul.f32 %v3017_v39, %v3189_v51  ;;  %v1309_v27 = vmul.f32 %v3019_v40, %v3189_v51  ;;  %v986_v28 = vadd.f32 %v978_v19, %v3125_v55  ;;  %v1090_v61 = vadd.f32 %v1082_v50, %v3127_v60 }
 0x187   : > { %v1195_v2 = vadd.f32 %v1187_v45, %v3129_v3  ;;  %v1300_v12 = vadd.f32 %v1292_v52, %v3131_v9  ;;  %v1003_v1 = vadd.f32 %v995_v59, %v985_v31  ;;  %v1107_v4 = vadd.f32 %v1099_v15, %v1089_v13  ;;  %v3922_v3 = vld [vmem:[#allocation48_spill] sm:$0xff] }
 0x188   : > { %v1212_v5 = vadd.f32 %v1204_v20, %v1194_v33  ;;  %v1317_v29 = vadd.f32 %v1309_v27, %v1299_v6  ;;  %v996_v44 = vmul.f32 %v3013_v49, %v3195_v42  ;;  %v1100_v22 = vmul.f32 %v3015_v54, %v3195_v42 }
 0x189   : > { %v1205_v55 = vmul.f32 %v3017_v39, %v3195_v42  ;;  %v1310_v60 = vmul.f32 %v3019_v40, %v3195_v42  ;;  %v1035_v51 = vadd.f32 %v3922_v3, %v1003_v1  ;;  %v1140_v9 = vadd.f32 %v3167_v53, %v1107_v4  ;;  %v3923_v4 = vld [vmem:[#allocation49_spill] sm:$0xff] }
 0x18a   : > { %v1245_v31 = vadd.f32 %v1234_v0, %v1212_v5  ;;  %v1350_v57 = vadd.f32 %v1339_v32, %v1317_v29  ;;  %v1004_v13 = vadd.f32 %v996_v44, %v986_v28  ;;  %v1108_v35 = vadd.f32 %v1100_v22, %v1090_v61  ;;  %v3924_v29 = vld [vmem:[#allocation50_spill] sm:$0xff]  ;;  %v3925_v44 = vld [vmem:[#allocation51_spill] sm:$0xff] }
 0x18b   : > { %v1213_v33 = vadd.f32 %v1205_v55, %v1195_v2  ;;  %v1318_v47 = vadd.f32 %v1310_v60, %v1300_v12  ;;  %v3343_v6 = vmax.f32 %v1035_v51, 0.0  ;;  %v3345_v19 = vmax.f32 %v1140_v9, 0.0  ;;  %v1239_v2 = vpop.permute.xlu1 %1238  ;;  %v3926_v55 = vld [vmem:[#allocation52_spill] sm:$0xff] }
 0x18c   : > { %v3347_v50 = vmax.f32 %v1245_v31, 0.0  ;;  %v3349_v45 = vmax.f32 %v1350_v57, 0.0  ;;  %v1036_v42 = vadd.f32 %v3922_v3, %v1004_v13  ;;  %v1141_v52 = vadd.f32 %v3167_v53, %v1108_v35 }
 0x18d   : > { %v1246_v59 = vadd.f32 %v1234_v0, %v1213_v33  ;;  %v1351_v15 = vadd.f32 %v1339_v32, %v1318_v47  ;;  %v979_v20 = vmul.f32 %v3005_v24, %v3201_v58  ;;  %v1083_v27 = vmul.f32 %v3007_v25, %v3201_v58  ;;  %v3927_v33 = vld [vmem:[#allocation53_spill] sm:$0xff] }
 0x18e   : > { %v1188_v28 = vmul.f32 %v3009_v48, %v3201_v58  ;;  %v1293_v61 = vmul.f32 %v3011_v37, %v3201_v58  ;;  %v3361_v12 = vmax.f32 %v1036_v42, 0.0  ;;  %v3363_v1 = vmax.f32 %v1141_v52, 0.0  ;;  %v3928_v42 = vld [vmem:[#allocation54_spill] sm:$0xff] }
 0x18f   : > { %v3365_v53 = vmax.f32 %v1246_v59, 0.0  ;;  %v3367_v0 = vmax.f32 %v1351_v15, 0.0  ;;  %v987_v5 = vadd.f32 %v979_v20, %v3923_v4  ;;  %v1091_v32 = vadd.f32 %v1083_v27, %v3924_v29  ;;  %v3929_v59 = vld [vmem:[#allocation55_spill] sm:$0xff]  ;;  %v3930_v20 = vld [vmem:[#allocation56_spill] sm:$0xff]  ;;  %v1344_v29 = vpop.permute.xlu1 %1343 }
 0x190   : > { %v1196_v22 = vadd.f32 %v1188_v28, %v3925_v44  ;;  %v1301_v60 = vadd.f32 %v1293_v61, %v3926_v55  ;;  %v980_v58 = vmul.f32 %v3005_v24, %v3205_v14  ;;  %v1084_v3 = vmul.f32 %v3007_v25, %v3205_v14 }
 0x191   : > { %v1189_v51 = vmul.f32 %v3009_v48, %v3205_v14  ;;  %v1294_v9 = vmul.f32 %v3011_v37, %v3205_v14  ;;  %v997_v31 = vmul.f32 %v3013_v49, %v3211_v21  ;;  %v1101_v57 = vmul.f32 %v3015_v54, %v3211_v21 }
 0x192   : > { %v1206_v13 = vmul.f32 %v3017_v39, %v3211_v21  ;;  %v1311_v35 = vmul.f32 %v3019_v40, %v3211_v21  ;;  %v988_v47 = vadd.f32 %v980_v58, %v3927_v33  ;;  %v1092_v52 = vadd.f32 %v1084_v3, %v3928_v42 }
 0x193   : > { %v1197_v15 = vadd.f32 %v1189_v51, %v3929_v59  ;;  %v1302_v14 = vadd.f32 %v1294_v9, %v3930_v20  ;;  %v1005_v27 = vadd.f32 %v997_v31, %v987_v5  ;;  %v1109_v28 = vadd.f32 %v1101_v57, %v1091_v32 }
 0x194   : > { %v1214_v61 = vadd.f32 %v1206_v13, %v1196_v22  ;;  %v1319_v4 = vadd.f32 %v1311_v35, %v1301_v60  ;;  %v998_v44 = vmul.f32 %v3013_v49, %v3216_v30  ;;  %v1102_v55 = vmul.f32 %v3015_v54, %v3216_v30 }
 0x195   : > { %v1207_v21 = vmul.f32 %v3017_v39, %v3216_v30  ;;  %v1312_v58 = vmul.f32 %v3019_v40, %v3216_v30  ;;  %v1037_v3 = vadd.f32 %v3203_v16, %v1005_v27  ;;  %v1142_v5 = vadd.f32 %v3237_v63, %v1109_v28  ;;  %v3931_v27 = vld [vmem:[#allocation12_spill] sm:$0xff] }
 0x196   : > { %v1247_v32 = vadd.f32 %v1239_v2, %v1214_v61  ;;  %v1352_v22 = vadd.f32 %v1344_v29, %v1319_v4  ;;  %v1006_v60 = vadd.f32 %v998_v44, %v988_v47  ;;  %v1110_v51 = vadd.f32 %v1102_v55, %v1092_v52  ;;  %v3933_v44 = vld [vmem:[#allocation14_spill] sm:$0xff] }
 0x197   : > { %v1215_v9 = vadd.f32 %v1207_v21, %v1197_v15  ;;  %v1320_v31 = vadd.f32 %v1312_v58, %v1302_v14  ;;  %v3403_v57 = vmax.f32 %v1037_v3, 0.0  ;;  %v3405_v13 = vmax.f32 %v1142_v5, 0.0  ;;  %v3932_v15 = vld [vmem:[#allocation13_spill] sm:$0xff]  ;;  %v3934_v58 = vld [vmem:[#allocation15_spill] sm:$0xff] }
 0x198   : > { %v3407_v35 = vmax.f32 %v1247_v32, 0.0  ;;  %v3409_v33 = vmax.f32 %v1352_v22, 0.0  ;;  %v1038_v30 = vadd.f32 %v3203_v16, %v1006_v60  ;;  %v1143_v42 = vadd.f32 %v3237_v63, %v1110_v51  ;;  %v3935_v32 = vld [vmem:[#allocation16_spill] sm:$0xff] }
 0x199   : > { %v1248_v59 = vadd.f32 %v1239_v2, %v1215_v9  ;;  %v1353_v20 = vadd.f32 %v1344_v29, %v1320_v31  ;;  %v1363_v47 = vmul.f32 %v3239_v41, %v3931_v27  ;;  %v1365_v52 = vmul.f32 %v3301_v10, %v3931_v27  ;;  %v3936_v31 = vld [vmem:[#allocation17_spill] sm:$0xff] }
 0x19a   : > { %v1371_v14 = vmul.f32 %v3241_v56, %v3932_v15  ;;  %v1373_v28 = vmul.f32 %v3303_v38, %v3932_v15  ;;  %v3421_v61 = vmax.f32 %v1038_v30, 0.0  ;;  %v3423_v4 = vmax.f32 %v1143_v42, 0.0 }
 0x19b   : > { %v3425_v16 = vmax.f32 %v1248_v59, 0.0  ;;  %v3427_v63 = vmax.f32 %v1353_v20, 0.0  ;;  %v1387_v55 = vmul.f32 %v3243_v46, %v3933_v44  ;;  %v1389_v21 = vmul.f32 %v3305_v62, %v3933_v44  ;;  %v3937_v59 = vld [vmem:[#allocation18_spill] sm:$0xff] }
 0x19c   : > { %v1379_v2 = vadd.f32 %v1371_v14, %v1363_v47  ;;  %v1381_v29 = vadd.f32 %v1373_v28, %v1365_v52  ;;  %v1403_v3 = vmul.f32 %v3245_v43, %v3934_v58  ;;  %v1405_v5 = vmul.f32 %v3307_v23, %v3934_v58  ;;  %v3938_v52 = vld [vmem:[#allocation19_spill] sm:$0xff] }
 0x19d   : > { %v1419_v22 = vmul.f32 %v3239_v41, %v3935_v32  ;;  %v1421_v60 = vmul.f32 %v3301_v10, %v3935_v32  ;;  %v1427_v30 = vmul.f32 %v3241_v56, %v3936_v31  ;;  %v1429_v42 = vmul.f32 %v3303_v38, %v3936_v31 }
 0x19e   : > { %v1395_v51 = vadd.f32 %v1387_v55, %v1379_v2  ;;  %v1397_v9 = vadd.f32 %v1389_v21, %v1381_v29  ;;  %v1443_v20 = vmul.f32 %v3243_v46, %v3937_v59  ;;  %v1445_v47 = vmul.f32 %v3305_v62, %v3937_v59 }
 0x19f   : > { %v1459_v14 = vmul.f32 %v3245_v43, %v3938_v52  ;;  %v1461_v28 = vmul.f32 %v3307_v23, %v3938_v52  ;;  %v1435_v55 = vadd.f32 %v1427_v30, %v1419_v22  ;;  %v1437_v21 = vadd.f32 %v1429_v42, %v1421_v60 }
 0x1a0   : > { %v1411_v2 = vadd.f32 %v1403_v3, %v1395_v51  ;;  %v1413_v29 = vadd.f32 %v1405_v5, %v1397_v9  ;;  %v1362_v40 = vmul.f32 %v3218_v11, %v3931_v27  ;;  %v1364_v39 = vmul.f32 %v3282_v34, %v3931_v27 }
 0x1a1   : > { %v1370_v54 = vmul.f32 %v3220_v17, %v3932_v15  ;;  %v1372_v49 = vmul.f32 %v3284_v36, %v3932_v15  ;;  %v1451_v48 = vadd.f32 %v1443_v20, %v1435_v55  ;;  %v1453_v25 = vadd.f32 %v1445_v47, %v1437_v21 }
 0x1a2   : > { %v2238_v37 = vpack.c.bf16 %v1413_v29, %v1411_v2  ;;  %v1386_v3 = vmul.f32 %v3222_v26, %v3933_v44  ;;  %v1388_v60 = vmul.f32 %v3286_v8, %v3933_v44  ;;  %v1402_v51 = vmul.f32 %v3224_v18, %v3934_v58 }
 0x1a3   : > { %v1378_v5 = vadd.f32 %v1370_v54, %v1362_v40  ;;  %v1380_v22 = vadd.f32 %v1372_v49, %v1364_v39  ;;  %v1467_v9 = vadd.f32 %v1459_v14, %v1451_v48  ;;  %v1469_v30 = vadd.f32 %v1461_v28, %v1453_v25 }
 0x1a4   : > { %2239 = vmatprep.subr.bf16.mxu0 %v2238_v37  ;;  %v1404_v42 = vmul.f32 %v3288_v7, %v3934_v58  ;;  %v1418_v20 = vmul.f32 %v3218_v11, %v3935_v32  ;;  %v1420_v49 = vmul.f32 %v3282_v34, %v3935_v32  ;;  %v1426_v54 = vmul.f32 %v3220_v17, %v3936_v31 }
 0x1a5   : > { %v1394_v47 = vadd.f32 %v1386_v3, %v1378_v5  ;;  %v1396_v2 = vadd.f32 %v1388_v60, %v1380_v22  ;;  %v2246_v39 = vpack.c.bf16 %v1469_v30, %v1467_v9  ;;  %v1428_v37 = vmul.f32 %v3284_v36, %v3936_v31 }
 0x1a6   : > { %v1442_v25 = vmul.f32 %v3222_v26, %v3937_v59  ;;  %v1444_v48 = vmul.f32 %v3286_v8, %v3937_v59  ;;  %v1434_v28 = vadd.f32 %v1426_v54, %v1418_v20  ;;  %v1458_v29 = vmul.f32 %v3224_v18, %v3938_v52 }
 0x1a7   : > { %v1410_v40 = vadd.f32 %v1402_v51, %v1394_v47  ;;  %v1412_v14 = vadd.f32 %v1404_v42, %v1396_v2  ;;  %2247 = vmatprep.subr.bf16.mxu1 %v2246_v39  ;;  %v1436_v55 = vadd.f32 %v1428_v37, %v1420_v49  ;;  %v1460_v21 = vmul.f32 %v3288_v7, %v3938_v52 }
 0x1a8   : > { %v1367_v3 = vmul.f32 %v3361_v12, %v3931_v27  ;;  %v1369_v5 = vmul.f32 %v3421_v61, %v3931_v27  ;;  %v1450_v60 = vadd.f32 %v1442_v25, %v1434_v28  ;;  %v1375_v51 = vmul.f32 %v3363_v1, %v3932_v15 }
 0x1a9   : > { %v2240_v22 = vpack.c.bf16 %v1412_v14, %v1410_v40  ;;  %v1377_v9 = vmul.f32 %v3423_v4, %v3932_v15  ;;  %v1452_v30 = vadd.f32 %v1444_v48, %v1436_v55  ;;  %v1391_v42 = vmul.f32 %v3365_v53, %v3933_v44 }
 0x1aa   : > { %v1393_v20 = vmul.f32 %v3425_v16, %v3933_v44  ;;  %v1407_v47 = vmul.f32 %v3367_v0, %v3934_v58  ;;  %v1466_v2 = vadd.f32 %v1458_v29, %v1450_v60  ;;  %v1383_v49 = vadd.f32 %v1375_v51, %v1367_v3 }
 0x1ab   : > { %2241 = vmatpush1.bf16.msra.mxu0 %v2240_v22  ;;  %v1385_v54 = vadd.f32 %v1377_v9, %v1369_v5  ;;  %v1409_v39 = vmul.f32 %v3427_v63, %v3934_v58  ;;  %v1468_v37 = vadd.f32 %v1460_v21, %v1452_v30  ;;  %v1423_v25 = vmul.f32 %v3361_v12, %v3935_v32 }
 0x1ac   : > { %v1425_v48 = vmul.f32 %v3421_v61, %v3935_v32  ;;  %v1431_v40 = vmul.f32 %v3363_v1, %v3936_v31  ;;  %v1399_v14 = vadd.f32 %v1391_v42, %v1383_v49  ;;  %v1433_v29 = vmul.f32 %v3423_v4, %v3936_v31 }
 0x1ad   : > { %v1401_v28 = vadd.f32 %v1393_v20, %v1385_v54  ;;  %v1447_v55 = vmul.f32 %v3365_v53, %v3937_v59  ;;  %v2248_v3 = vpack.c.bf16 %v1468_v37, %v1466_v2  ;;  %v1449_v21 = vmul.f32 %v3425_v16, %v3937_v59 }
 0x1ae   : > { %v1439_v5 = vadd.f32 %v1431_v40, %v1423_v25  ;;  %v1463_v22 = vmul.f32 %v3367_v0, %v3938_v52  ;;  %v1415_v60 = vadd.f32 %v1407_v47, %v1399_v14  ;;  %v1441_v9 = vadd.f32 %v1433_v29, %v1425_v48 }
 0x1af   : > { %v1417_v51 = vadd.f32 %v1409_v39, %v1401_v28  ;;  %v1465_v30 = vmul.f32 %v3427_v63, %v3938_v52  ;;  %2249 = vmatpush1.bf16.msra.mxu1 %v2248_v3  ;;  %v1366_v20 = vmul.f32 %v3343_v6, %v3931_v27  ;;  %v1368_v2 = vmul.f32 %v3403_v57, %v3931_v27 }
 0x1b0   : > { %v1455_v42 = vadd.f32 %v1447_v55, %v1439_v5  ;;  %v1374_v49 = vmul.f32 %v3345_v19, %v3932_v15  ;;  %v1457_v37 = vadd.f32 %v1449_v21, %v1441_v9  ;;  %v1376_v47 = vmul.f32 %v3405_v13, %v3932_v15 }
 0x1b1   : > { %v2242_v54 = vpack.c.bf16 %v1417_v51, %v1415_v60  ;;  %v1390_v39 = vmul.f32 %v3347_v50, %v3933_v44  ;;  %v1392_v40 = vmul.f32 %v3407_v35, %v3933_v44  ;;  %v1406_v14 = vmul.f32 %v3349_v45, %v3934_v58 }
 0x1b2   : > { %v1471_v25 = vadd.f32 %v1463_v22, %v1455_v42  ;;  %v1382_v48 = vadd.f32 %v1374_v49, %v1366_v20  ;;  %v1473_v27 = vadd.f32 %v1465_v30, %v1457_v37  ;;  %v1384_v28 = vadd.f32 %v1376_v47, %v1368_v2  ;;  %v3939_v20 = vld [vmem:[#allocation20_spill] sm:$0xff] }
 0x1b3   : > { %2243 = vmatprep.subr.bf16.mxu0 %v2242_v54  ;;  %v1408_v29 = vmul.f32 %v3409_v33, %v3934_v58  ;;  %v1422_v15 = vmul.f32 %v3343_v6, %v3935_v32  ;;  %v1424_v3 = vmul.f32 %v3403_v57, %v3935_v32  ;;  %v1430_v5 = vmul.f32 %v3345_v19, %v3936_v31 }
 0x1b4   : > { %v1398_v55 = vadd.f32 %v1390_v39, %v1382_v48  ;;  %v1432_v44 = vmul.f32 %v3405_v13, %v3936_v31  ;;  %v2250_v21 = vpack.c.bf16 %v1473_v27, %v1471_v25  ;;  %v1400_v22 = vadd.f32 %v1392_v40, %v1384_v28  ;;  %v3941_v48 = vld [vmem:[#allocation22_spill] sm:$0xff] }
 0x1b5   : > { %v1446_v60 = vmul.f32 %v3347_v50, %v3937_v59  ;;  %v1448_v58 = vmul.f32 %v3407_v35, %v3937_v59  ;;  %v1438_v9 = vadd.f32 %v1430_v5, %v1422_v15  ;;  %v1462_v32 = vmul.f32 %v3349_v45, %v3938_v52  ;;  %v3940_v59 = vld [vmem:[#allocation21_spill] sm:$0xff]  ;;  %v3943_v5 = vld [vmem:[#allocation24_spill] sm:$0xff] }
 0x1b6   : > { %v1414_v51 = vadd.f32 %v1406_v14, %v1398_v55  ;;  %v1440_v30 = vadd.f32 %v1432_v44, %v1424_v3  ;;  %2251 = vmatprep.subr.bf16.mxu1 %v2250_v21  ;;  %v1416_v42 = vadd.f32 %v1408_v29, %v1400_v22  ;;  %v1464_v31 = vmul.f32 %v3409_v33, %v3938_v52  ;;  %v3942_v14 = vld [vmem:[#allocation23_spill] sm:$0xff]  ;;  %v3944_v22 = vld [vmem:[#allocation25_spill] sm:$0xff] }
 0x1b7   : > { %v1475_v2 = vmul.f32 %v3239_v41, %v3939_v20  ;;  %v1477_v49 = vmul.f32 %v3301_v10, %v3939_v20  ;;  %v1454_v54 = vadd.f32 %v1446_v60, %v1438_v9  ;;  %v1483_v47 = vmul.f32 %v3241_v56, %v3940_v59 }
 0x1b8   : > { %v1456_v37 = vadd.f32 %v1448_v58, %v1440_v30  ;;  %v1485_v39 = vmul.f32 %v3303_v38, %v3940_v59  ;;  %v2244_v25 = vpack.c.bf16 %v1416_v42, %v1414_v51  ;;  %v1499_v40 = vmul.f32 %v3243_v46, %v3941_v48 }
 0x1b9   : > { %v1501_v52 = vmul.f32 %v3305_v62, %v3941_v48  ;;  %v1515_v27 = vmul.f32 %v3245_v43, %v3942_v14  ;;  %v1470_v28 = vadd.f32 %v1462_v32, %v1454_v54  ;;  %v1491_v15 = vadd.f32 %v1483_v47, %v1475_v2  ;;  %v1586_v32 = vld [vmem:[%s3783_s5] sm:$0xff]  ;;  %v3946_v2 = vld [vmem:[#allocation27_spill] sm:$0xff]  ;;  %v2200_v47 = vld [vmem:[%s3783_s5 + $0x8] sm:$0xff] }
 0x1ba   : > { %v1472_v29 = vadd.f32 %v1464_v31, %v1456_v37  ;;  %v1493_v55 = vadd.f32 %v1485_v39, %v1477_v49  ;;  %2245 = vmatpush1.bf16.msra.mxu0 %v2244_v25  ;;  %v1517_v3 = vmul.f32 %v3307_v23, %v3942_v14  ;;  %v1531_v44 = vmul.f32 %v3239_v41, %v3943_v5  ;;  %v3945_v31 = vld [vmem:[#allocation26_spill] sm:$0xff] }
 0x1bb   : > { %v1533_v21 = vmul.f32 %v3301_v10, %v3943_v5  ;;  %v1539_v60 = vmul.f32 %v3241_v56, %v3944_v22  ;;  %v1507_v51 = vadd.f32 %v1499_v40, %v1491_v15  ;;  %v1541_v30 = vmul.f32 %v3303_v38, %v3944_v22 }
 0x1bc   : > { %v2252_v58 = vpack.c.bf16 %v1472_v29, %v1470_v28  ;;  %v1509_v9 = vadd.f32 %v1501_v52, %v1493_v55  ;;  %v1555_v41 = vmul.f32 %v3243_v46, %v3945_v31  ;;  %v1557_v10 = vmul.f32 %v3305_v62, %v3945_v31 }
 0x1bd   : > { %v1547_v42 = vadd.f32 %v1539_v60, %v1531_v44  ;;  %v1571_v56 = vmul.f32 %v3245_v43, %v3946_v2  ;;  %v1523_v49 = vadd.f32 %v1515_v27, %v1507_v51  ;;  %v1549_v37 = vadd.f32 %v1541_v30, %v1533_v21  ;;  %2199 = vmatmul.mubr.msk.f32.vlgmr.msra.gmra.mrb[16].mxu0 %vm1587_vm1, %v1586_v32 }
 0x1be   : > { %2253 = vmatpush1.bf16.msra.mxu1 %v2252_v58  ;;  %v1525_v54 = vadd.f32 %v1517_v3, %v1509_v9  ;;  %v1573_v38 = vmul.f32 %v3307_v23, %v3946_v2  ;;  %v1474_v46 = vmul.f32 %v3218_v11, %v3939_v20  ;;  %v1476_v43 = vmul.f32 %v3282_v34, %v3939_v20 }
 0x1bf   : > { %v1563_v39 = vadd.f32 %v1555_v41, %v1547_v42  ;;  %v1482_v62 = vmul.f32 %v3220_v17, %v3940_v59  ;;  %v1565_v40 = vadd.f32 %v1557_v10, %v1549_v37  ;;  %v1484_v23 = vmul.f32 %v3284_v36, %v3940_v59 }
 0x1c0   : > { %v2254_v25 = vpack.c.bf16 %v1525_v54, %v1523_v49  ;;  %v1498_v52 = vmul.f32 %v3222_v26, %v3941_v48  ;;  %v3947_v27 = vmov 0.0   ;;  %v1500_v15 = vmul.f32 %v3286_v8, %v3941_v48 }
 0x1c1   : > { %1807 = vmatprep.mubr.f32.mxu0 %v3947_v27  ;;  %v1579_v28 = vadd.f32 %v1571_v56, %v1563_v39  ;;  %2201 = vmatmul.mubr.msk.f32.vlgmr.msra.gmra.mrb[16].mxu1 %vm1587_vm1, %v2200_v47  ;;  %v1490_v29 = vadd.f32 %v1482_v62, %v1474_v46  ;;  %v1514_v55 = vmul.f32 %v3224_v18, %v3942_v14 }
 0x1c2   : > { %2255 = vmatprep.subr.bf16.mxu0 %v2254_v25  ;;  %v1581_v3 = vadd.f32 %v1573_v38, %v1565_v40  ;;  %v1492_v44 = vadd.f32 %v1484_v23, %v1476_v43  ;;  %v1516_v21 = vmul.f32 %v3288_v7, %v3942_v14  ;;  %v1530_v60 = vmul.f32 %v3218_v11, %v3943_v5 }
 0x1c3   : > { %v1506_v58 = vadd.f32 %v1498_v52, %v1490_v29  ;;  %v1532_v51 = vmul.f32 %v3282_v34, %v3943_v5  ;;  %v1538_v9 = vmul.f32 %v3220_v17, %v3944_v22  ;;  %v1540_v30 = vmul.f32 %v3284_v36, %v3944_v22  ;;  %1883 = vmatprep.mubr.f32.mxu1 %v3947_v27 }
 0x1c4   : > { %v2262_v32 = vpack.c.bf16 %v1581_v3, %v1579_v28  ;;  %v1508_v42 = vadd.f32 %v1500_v15, %v1492_v44  ;;  %v1554_v41 = vmul.f32 %v3222_v26, %v3945_v31  ;;  %v1556_v11 = vmul.f32 %v3286_v8, %v3945_v31 }
 0x1c5   : > { %v1522_v10 = vadd.f32 %v1514_v55, %v1506_v58  ;;  %v1546_v56 = vadd.f32 %v1538_v9, %v1530_v60  ;;  %v1548_v49 = vadd.f32 %v1540_v30, %v1532_v51  ;;  %v1570_v34 = vmul.f32 %v3224_v18, %v3946_v2 }
 0x1c6   : > { %2263 = vmatprep.subr.bf16.mxu1 %v2262_v32  ;;  %v1524_v17 = vadd.f32 %v1516_v21, %v1508_v42  ;;  %v1572_v36 = vmul.f32 %v3288_v7, %v3946_v2  ;;  %v1479_v54 = vmul.f32 %v3361_v12, %v3939_v20  ;;  %v1481_v26 = vmul.f32 %v3421_v61, %v3939_v20 }
 0x1c7   : > { %v1562_v37 = vadd.f32 %v1554_v41, %v1546_v56  ;;  %v1564_v38 = vadd.f32 %v1556_v11, %v1548_v49  ;;  %v1487_v8 = vmul.f32 %v3363_v1, %v3940_v59  ;;  %v1489_v47 = vmul.f32 %v3423_v4, %v3940_v59 }
 0x1c8   : > { %v2256_v18 = vpack.c.bf16 %v1524_v17, %v1522_v10  ;;  %v1503_v39 = vmul.f32 %v3365_v53, %v3941_v48  ;;  %v1505_v7 = vmul.f32 %v3425_v16, %v3941_v48  ;;  %v1519_v46 = vmul.f32 %v3367_v0, %v3942_v14 }
 0x1c9   : > { %v1578_v43 = vadd.f32 %v1570_v34, %v1562_v37  ;;  %v1580_v62 = vadd.f32 %v1572_v36, %v1564_v38  ;;  %v1495_v25 = vadd.f32 %v1487_v8, %v1479_v54  ;;  %v1497_v40 = vadd.f32 %v1489_v47, %v1481_v26 }
 0x1ca   : > { %2257 = vmatpush1.bf16.msra.mxu0 %v2256_v18  ;;  %v1521_v23 = vmul.f32 %v3427_v63, %v3942_v14  ;;  %v1535_v52 = vmul.f32 %v3361_v12, %v3943_v5  ;;  %v1537_v27 = vmul.f32 %v3421_v61, %v3943_v5  ;;  %v1543_v28 = vmul.f32 %v3363_v1, %v3944_v22 }
 0x1cb   : > { %v2264_v29 = vpack.c.bf16 %v1580_v62, %v1578_v43  ;;  %v1511_v15 = vadd.f32 %v1503_v39, %v1495_v25  ;;  %v1513_v55 = vadd.f32 %v1505_v7, %v1497_v40  ;;  %v1545_v3 = vmul.f32 %v3423_v4, %v3944_v22  ;;  %v3950_v43 = vld [vmem:[#allocation30_spill] sm:$0xff]  ;;  %v3951_v25 = vld [vmem:[#allocation31_spill] sm:$0xff] }
 0x1cc   : > { %v1551_v44 = vadd.f32 %v1543_v28, %v1535_v52  ;;  %v1559_v21 = vmul.f32 %v3365_v53, %v3945_v31  ;;  %v1561_v60 = vmul.f32 %v3425_v16, %v3945_v31  ;;  %v1575_v1 = vmul.f32 %v3367_v0, %v3946_v2 }
 0x1cd   : > { %2265 = vmatpush1.bf16.msra.mxu1 %v2264_v29  ;;  %v1527_v12 = vadd.f32 %v1519_v46, %v1511_v15  ;;  %v1529_v58 = vadd.f32 %v1521_v23, %v1513_v55  ;;  %v1553_v61 = vadd.f32 %v1545_v3, %v1537_v27  ;;  %v1478_v9 = vmul.f32 %v3343_v6, %v3939_v20  ;;  %v3952_v55 = vld [vmem:[#allocation32_spill] sm:$0xff] }
 0x1ce   : > { %v1567_v51 = vadd.f32 %v1559_v21, %v1551_v44  ;;  %v1480_v4 = vmul.f32 %v3403_v57, %v3939_v20  ;;  %v1486_v53 = vmul.f32 %v3345_v19, %v3940_v59  ;;  %v1577_v16 = vmul.f32 %v3427_v63, %v3946_v2  ;;  %v3953_v44 = vld [vmem:[#allocation33_spill] sm:$0xff] }
 0x1cf   : > { %v2258_v30 = vpack.c.bf16 %v1529_v58, %v1527_v12  ;;  %v1569_v32 = vadd.f32 %v1561_v60, %v1553_v61  ;;  %v1488_v42 = vmul.f32 %v3405_v13, %v3940_v59  ;;  %v1502_v11 = vmul.f32 %v3347_v50, %v3941_v48  ;;  %v3954_v60 = vld [vmem:[#allocation34_spill] sm:$0xff]  ;;  %v3955_v58 = vld [vmem:[#allocation35_spill] sm:$0xff] }
 0x1d0   : > { %v1583_v41 = vadd.f32 %v1575_v1, %v1567_v51  ;;  %v1494_v0 = vadd.f32 %v1486_v53, %v1478_v9  ;;  %v1504_v10 = vmul.f32 %v3407_v35, %v3941_v48  ;;  %v1518_v49 = vmul.f32 %v3349_v45, %v3942_v14 }
 0x1d1   : > { %2259 = vmatprep.subr.bf16.mxu0 %v2258_v30  ;;  %v1585_v20 = vadd.f32 %v1577_v16, %v1569_v32  ;;  %v1496_v56 = vadd.f32 %v1488_v42, %v1480_v4  ;;  %v1534_v63 = vmul.f32 %v3343_v6, %v3943_v5  ;;  %v1536_v59 = vmul.f32 %v3403_v57, %v3943_v5 }
 0x1d2   : > { %v1510_v34 = vadd.f32 %v1502_v11, %v1494_v0  ;;  %v1542_v17 = vmul.f32 %v3345_v19, %v3944_v22  ;;  %v1544_v36 = vmul.f32 %v3405_v13, %v3944_v22  ;;  %v1520_v26 = vmul.f32 %v3409_v33, %v3942_v14 }
 0x1d3   : > { %v2266_v48 = vpack.c.bf16 %v1585_v20, %v1583_v41  ;;  %v1512_v54 = vadd.f32 %v1504_v10, %v1496_v56  ;;  %v1558_v37 = vmul.f32 %v3347_v50, %v3945_v31  ;;  %v1560_v57 = vmul.f32 %v3407_v35, %v3945_v31  ;;  %v2202_v50 = vld [vmem:[%s3783_s5 + $0x10] sm:$0xff]  ;;  %v2204_v35 = vld [vmem:[%s3783_s5 + $0x18] sm:$0xff] }
 0x1d4   : > { %v1526_v38 = vadd.f32 %v1518_v49, %v1510_v34  ;;  %v1550_v6 = vadd.f32 %v1542_v17, %v1534_v63  ;;  %v1552_v8 = vadd.f32 %v1544_v36, %v1536_v59  ;;  %v1574_v13 = vmul.f32 %v3349_v45, %v3946_v2  ;;  %v3956_v49 = vld [vmem:[#allocation36_spill] sm:$0xff]  ;;  %v3957_v34 = vld [vmem:[#allocation37_spill] sm:$0xff]  ;;  %v3958_v17 = vld [vmem:[#allocation38_spill] sm:$0xff] }
 0x1d5   : > { %2267 = vmatprep.subr.bf16.mxu1 %v2266_v48  ;;  %v1528_v5 = vadd.f32 %v1520_v26, %v1512_v54  ;;  %v1576_v22 = vmul.f32 %v3409_v33, %v3946_v2  ;;  %v3948_v33 = vld [vmem:[#allocation28_spill] sm:$0xff]  ;;  %v3949_v2 = vld [vmem:[#allocation29_spill] sm:$0xff]  ;;  %v1933_v54 = vpop.permute.xlu1 %1932  ;;  %v1908_v26 = vpop.permute.xlu0 %1907 }
 0x1d6   : > { %v1566_v19 = vadd.f32 %v1558_v37, %v1550_v6  ;;  %v1568_v47 = vadd.f32 %v1560_v57, %v1552_v8 }
 0x1d7   : > { %v2260_v14 = vpack.c.bf16 %v1528_v5, %v1526_v38 }
 0x1d8   : > { %v1582_v18 = vadd.f32 %v1574_v13, %v1566_v19  ;;  %v1584_v39 = vadd.f32 %v1576_v22, %v1568_v47 }
 0x1d9   : > { %2261 = vmatpush1.bf16.msra.mxu0 %v2260_v14 }
 0x1da   : > { %v2268_v7 = vpack.c.bf16 %v1584_v39, %v1582_v18 }
 0x1dc   : > { %2269 = vmatpush1.bf16.msra.mxu1 %v2268_v7  ;;  %2203 = vmatmul.mubr.msk.f32.vlgmr.msra.gmra.mrb[18].mxu0 %vm1587_vm1, %v2202_v50  ;;  %v3959_v7 = vld [vmem:[#allocation39_spill] sm:$0xff] }
 0x1df   : > { %2205 = vmatmul.mubr.msk.f32.vlgmr.msra.gmra.mrb[18].mxu1 %vm1587_vm1, %v2204_v35  ;;  %v3960_v35 = vld [vmem:[#allocation40_spill] sm:$0xff] }
 0x290   : > { %v1657_v45 = vpop.f32.mrb[16].mxu0 }
 0x291   : > { %v1890_v31 = vmul.f32 %v1657_v45, %v3948_v33  ;;  %v1914_v46 = vmul.f32 %v1657_v45, %v3949_v2  ;;  %v1939_v62 = vmul.f32 %v1657_v45, %v3950_v43  ;;  %v1964_v40 = vmul.f32 %v1657_v45, %v3951_v25  ;;  %v1659_v23 = vpop.f32.mrb[17].mxu0 }
 0x292   : > { %v1891_v27 = vmul.f32 %v1659_v23, %v3948_v33  ;;  %v1915_v28 = vmul.f32 %v1659_v23, %v3949_v2  ;;  %v1940_v29 = vmul.f32 %v1659_v23, %v3950_v43  ;;  %v1965_v15 = vmul.f32 %v1659_v23, %v3951_v25  ;;  %v3961_v33 = vld [vmem:[#allocation41_spill] sm:$0xff]  ;;  %v3962_v2 = vld [vmem:[#allocation42_spill] sm:$0xff] }
 0x294   : > { %v1733_v52 = vpop.f32.mrb[16].mxu1 }
 0x295   : > { %v1892_v3 = vmul.f32 %v1733_v52, %v3952_v55  ;;  %v1916_v21 = vmul.f32 %v1733_v52, %v3953_v44  ;;  %v1941_v12 = vmul.f32 %v1733_v52, %v3954_v60  ;;  %v1966_v61 = vmul.f32 %v1733_v52, %v3955_v58  ;;  %v1735_v1 = vpop.f32.mrb[17].mxu1 }
 0x296   : > { %v1893_v51 = vmul.f32 %v1735_v1, %v3952_v55  ;;  %v1917_v9 = vmul.f32 %v1735_v1, %v3953_v44  ;;  %v1942_v4 = vmul.f32 %v1735_v1, %v3954_v60  ;;  %v1967_v53 = vmul.f32 %v1735_v1, %v3955_v58 }
 0x297   : > { %v1894_v30 = vadd.f32 %v1892_v3, %v1890_v31  ;;  %v1918_v32 = vadd.f32 %v1916_v21, %v1914_v46  ;;  %v1943_v16 = vadd.f32 %v1941_v12, %v1939_v62  ;;  %v1968_v42 = vadd.f32 %v1966_v61, %v1964_v40 }
 0x298   : > { %v1895_v41 = vadd.f32 %v1893_v51, %v1891_v27  ;;  %v1919_v0 = vadd.f32 %v1917_v9, %v1915_v28  ;;  %v1944_v11 = vadd.f32 %v1942_v4, %v1940_v29  ;;  %v1969_v10 = vadd.f32 %v1967_v53, %v1965_v15  ;;  %v1983_v29 = vpop.permute.xlu1 %1982  ;;  %v1958_v15 = vpop.permute.xlu0 %1957 }
 0x2af   : > { %v1809_v20 = vpop.f32.mrb[18].mxu0 }
 0x2b0   : > { %v1896_v56 = vmul.f32 %v1809_v20, %v3005_v24  ;;  %v1920_v63 = vmul.f32 %v1809_v20, %v3956_v49  ;;  %v1945_v59 = vmul.f32 %v1809_v20, %v3957_v34  ;;  %v1970_v36 = vmul.f32 %v1809_v20, %v3958_v17  ;;  %v1811_v48 = vpop.f32.mrb[19].mxu0 }
 0x2b1   : > { %v1897_v37 = vmul.f32 %v1811_v48, %v3005_v24  ;;  %v1921_v38 = vmul.f32 %v1811_v48, %v3956_v49  ;;  %v1946_v6 = vmul.f32 %v1811_v48, %v3957_v34  ;;  %v1971_v8 = vmul.f32 %v1811_v48, %v3958_v17 }
 0x2b2   : > { %v1898_v57 = vadd.f32 %v1896_v56, %v1894_v30  ;;  %v1922_v5 = vadd.f32 %v1920_v63, %v1918_v32  ;;  %v1947_v19 = vadd.f32 %v1945_v59, %v1943_v16  ;;  %v1972_v47 = vadd.f32 %v1970_v36, %v1968_v42  ;;  %v1885_v13 = vpop.f32.mrb[18].mxu1 }
 0x2b3   : > { %v1899_v22 = vadd.f32 %v1897_v37, %v1895_v41  ;;  %v1923_v14 = vadd.f32 %v1921_v38, %v1919_v0  ;;  %v1948_v18 = vadd.f32 %v1946_v6, %v1944_v11  ;;  %v1973_v39 = vadd.f32 %v1971_v8, %v1969_v10  ;;  %v1887_v50 = vpop.f32.mrb[19].mxu1 }
 0x2b4   : > { %v1900_v24 = vmul.f32 %v1885_v13, %v3959_v7  ;;  %v1924_v45 = vmul.f32 %v1885_v13, %v3960_v35  ;;  %v1949_v31 = vmul.f32 %v1885_v13, %v3961_v33  ;;  %v1974_v46 = vmul.f32 %v1885_v13, %v3962_v2 }
 0x2b5   : > { %v1901_v43 = vmul.f32 %v1887_v50, %v3959_v7  ;;  %v1925_v62 = vmul.f32 %v1887_v50, %v3960_v35  ;;  %v1950_v25 = vmul.f32 %v1887_v50, %v3961_v33  ;;  %v1975_v40 = vmul.f32 %v1887_v50, %v3962_v2 }
 0x2b6   : > { %v1902_v23 = vadd.f32 %v1900_v24, %v1898_v57  ;;  %v1926_v52 = vadd.f32 %v1924_v45, %v1922_v5  ;;  %v1951_v27 = vadd.f32 %v1949_v31, %v1947_v19  ;;  %v1976_v28 = vadd.f32 %v1974_v46, %v1972_v47 }
 0x2b7   : > { %v1903_v55 = vadd.f32 %v1901_v43, %v1899_v22  ;;  %v1927_v3 = vadd.f32 %v1925_v62, %v1923_v14  ;;  %v1952_v44 = vadd.f32 %v1950_v25, %v1948_v18  ;;  %v1977_v21 = vadd.f32 %v1975_v40, %v1973_v39 }
 0x2b8   : > { %v1910_v60 = vadd.f32 %v1908_v26, %v1902_v23  ;;  %v1935_v12 = vadd.f32 %v1933_v54, %v1926_v52  ;;  %v1960_v58 = vadd.f32 %v1958_v15, %v1951_v27  ;;  %v1985_v61 = vadd.f32 %v1983_v29, %v1976_v28 }
 0x2b9   : > { %v1911_v1 = vadd.f32 %v1908_v26, %v1903_v55  ;;  %v1936_v51 = vadd.f32 %v1933_v54, %v1927_v3  ;;  %v1961_v9 = vadd.f32 %v1958_v15, %v1952_v44  ;;  %v1986_v4 = vadd.f32 %v1983_v29, %v1977_v21 }
 0x2ba   : > { %v1912_v53 = vmax.f32 %v1910_v60, 0.0  ;;  %v1937_v30 = vmax.f32 %v1935_v12, 0.0  ;;  %v1962_v32 = vmax.f32 %v1960_v58, 0.0  ;;  %v1987_v16 = vmax.f32 %v1985_v61, 0.0 }
 0x2bb   : > { %v1913_v42 = vmax.f32 %v1911_v1, 0.0  ;;  %v1938_v41 = vmax.f32 %v1936_v51, 0.0  ;;  %v1963_v0 = vmax.f32 %v1961_v9, 0.0  ;;  %v1988_v11 = vmax.f32 %v1986_v4, 0.0 }
 0x2bc   : > { %1989 = vst [vmem:[%s353_s29] sm:$0xff] %v1912_v53  ;;  %2209 = vst [vmem:[%s353_s29 + $0x10] sm:$0xff] %v1937_v30 }
 0x2bd   : > { %2211 = vst [vmem:[%s353_s29 + $0x20] sm:$0xff] %v1962_v32  ;;  %2213 = vst [vmem:[%s353_s29 + $0x30] sm:$0xff] %v1987_v16 }
 0x2be   : > { %1990 = vst [vmem:[%s353_s29 + $0x8] sm:$0xff] %v1913_v42  ;;  %2210 = vst [vmem:[%s353_s29 + $0x18] sm:$0xff] %v1938_v41 }
 0x2bf   : > { %2212 = vst [vmem:[%s353_s29 + $0x28] sm:$0xff] %v1963_v0  ;;  %2214 = vst [vmem:[%s353_s29 + $0x38] sm:$0xff] %v1988_v11 }
 0x2c0   : > { %2380 = shalt.err (!%p2377_p4)
}
 0x2c1   : > { %s2381_s14 = scalar_lea.hbm %s3732_s28, 1024  ;;  %s2385_s15 = scalar_lea.hbm %s3785_s7, 2048 }
 0x2c2   : > { %p2382_p5 = scmp.ne.s32.totalorder %s3732_s28, %s2381_s14  ;;  %p2386_p12 = scmp.lt.u32.totalorder %s3732_s28, %s3785_s7 }
 0x2c3   : > { %p2387_p0 = scmp.lt.u32.totalorder %s2385_s15, %s2381_s14  ;;  %p2389_p8 = scmp.lt.u32.totalorder %s2381_s14, %s3732_s28 }
 0x2c4   : > { %p2383_p6 = pnand %p2382_p5, %p3963_p7 }
 0x2c5   : > { %p2388_p2 = por %p2387_p0, %p2386_p12 }
 0x2c6   : > { %p2384_p11 = pneg %p2383_p6 }
 0x2c7   : > { %p2390_p9 = por %p2389_p8, %p2388_p2 }
 0x2c9   : > { %p2391_p13 = pnand %p2390_p9, %p2384_p11 }
 0x2cb   : > { %2394 = shalt.err (!%p2391_p13)
}
 0x2cc   : > { %s2444_s8 = smov 256   ;;  %s2445_s29 = smov 512  }
 0x2cd   : > { %s2446_s17 = smov 16  }
 0x2ce   : > { %2278 = dma.vmem_to_hbm [thread:$0]  (%p3963_p7), %s3734_s22, 1024, %s3732_s28, %s2001_s9, %s2444_s8, %s2445_s29, %s2446_s17  }
 0x2cf PF: > { %s2029_s19 = sand.u32 1, %s2425_s24   ;;  %p3964_p1 = scmp.ne.s32.totalorder %s3860_s13, 0 }
 0x2d0   : > { %s2030_s21 = scalar_lea.sflag [#allocation3], %s2029_s19 }
 0x2d1   : > { %p2288_p3 = pnand %p2108_p10, %p3964_p1 }
 0x2d3   : > { %2420 = dma.done.wait (!%p2288_p3), %s2030_s21, 1024  }
 0x2d4   : > { %2422 = vsyncadd (!%p2288_p3), %s2030_s21, 4294966272  ;;  %p19_p4 = scmp.ge.s32.totalorder %s2512_s30, 4   ;;  %s3965_s24 = smov %s2429_s25 }
 0x2d5   : > { %s3966_s25 = smov %s2433_s26  ;;  %s3967_s26 = smov %s2524_s10 }
 0x2d6   : > { %s3968_s27 = smov %s2512_s30  ;;  %21 = sbr.rel (!%p19_p4) target bundleno = 9 (0x9), region = 138 }
 0x2dd   :  { %2035 = vsyncpa [#allocation3], 1 }
 0x2de   :  { %2037 = vsyncpa [#allocation3 + $0x1], 1 }
 0x2df   :  { %2038 = vsyncpa [#allocation4], 1 }
 0x2e0   :  { %2040 = vsyncpa [#allocation4 + $0x1], 1 }
 0x2e1   :  { %2041 = vsyncpa [#allocation6], 1 }

</bundles_post_ra>
